<compile_context>
chip_gen: v7x
topology: tpu7x:2x2x1
jax: 0.10.0
libtpu: 0.0.40
codegen_flags: <defaults>
</compile_context>

<pallas_src>
import functools

import jax
import jax.numpy as jnp
from jax import lax
from jax.experimental import pallas as pl
from jax.experimental.pallas import tpu as pltpu


def _round_up(v, m):
    return ((v + m - 1) // m) * m


def _full_spec(shape):
    return pl.BlockSpec(shape, lambda: (0,) * len(shape))


def _bilstm_head_kernel(x_ref, wih_ref, whh_ref, bias_ref, fcw_ref, fcb_ref,
                        lens_ref, out_ref, gx_ref, *, T, B, H, Sp, G):
    """Packed bidirectional LSTM recurrence + classification head, fully in-kernel.

    x_ref    : [T, B, Ip]  bf16 time-major input sequence (batch/feature padded)
    wih_ref  : [Ip, 2G]    bf16 input->gates weights (fwd gates | rev gates), packed
    whh_ref  : [Sp, G]     bf16 hidden->gates weights, block-diagonal fwd/rev packing
    bias_ref : [1, 2G]     f32 combined biases (b_ih + b_hh), fwd | rev
    fcw_ref  : [Sp, C]     f32 linear head weight in the packed hidden lane layout
    fcb_ref  : [1, C]      f32 linear head bias
    lens_ref : [B, 1]      int32 per-example text lengths (0 for padded rows)
    out_ref  : [B, C]      sigmoid(logits)
    gx_ref   : [T*B, 2G]   scratch: precomputed input-gate contributions (fwd | rev)
    """
    Ip = x_ref.shape[2]

    # ---- hoisted input projection: ONE MXU matmul for both directions, all steps ----
    x2d = x_ref[...].reshape(T * B, Ip)                                    # bf16
    gates_in = jnp.dot(x2d, wih_ref[...],
                       preferred_element_type=jnp.float32)                 # [T*B, 2G] f32
    # single fused bias add (fwd|rev), single store into the packed scratch
    gx_ref[...] = (gates_in + bias_ref[...]).astype(gx_ref.dtype)

    lens = lens_ref[...]                                                    # [B, 1] int32

    # ---- fused forward+reverse recurrence on ONE packed hidden state ----
    # h lanes [0,H) = forward hidden, [H,2H) = reverse hidden, rest zero padding.
    def body(t, carry):
        h, c, h_cap = carry
        row_f = pl.multiple_of(t * B, B)
        row_r = pl.multiple_of((T - 1 - t) * B, B)
        gx = (gx_ref[pl.ds(row_f, B), :G].astype(jnp.float32)
              + gx_ref[pl.ds(row_r, B), G:].astype(jnp.float32))
        g = gx + jnp.dot(h.astype(jnp.bfloat16), whh_ref[...],
                         preferred_element_type=jnp.float32)               # [B, G] f32
        # Gate slabs are whole 128-lane tiles; each slab covers BOTH directions, so
        # sigmoid/tanh (EUP) and the VPU cell math run once, not twice.
        i_g = jax.nn.sigmoid(g[:, 0 * Sp:1 * Sp])
        f_g = jax.nn.sigmoid(g[:, 1 * Sp:2 * Sp])
        g_g = jnp.tanh(g[:, 2 * Sp:3 * Sp])
        o_g = jax.nn.sigmoid(g[:, 3 * Sp:4 * Sp])
        c = f_g * c + i_g * g_g
        h = o_g * jnp.tanh(c)
        # capture forward hidden at step text_len-1 (per example); the reverse lanes
        # of the capture are never read by the head.
        h_cap = jnp.where(lens == t + 1, h, h_cap)
        return h, c, h_cap

    zero = jnp.zeros((B, Sp), jnp.float32)
    unroll = True if T <= 16 else 8          # full unroll only for small fixed T
    h_fin, _, h_cap = lax.fori_loop(0, T, body, (zero, zero, zero), unroll=unroll)

    # ---- classification head: fwd lanes from the capture, rev lanes from the final
    # step (reverse hidden at t=0); ONE matmul against the packed head weight ----
    # nn.Dropout -> identity at inference time.
    lane = lax.broadcasted_iota(jnp.int32, (B, Sp), 1)
    h_head = jnp.where(lane < H, h_cap, h_fin)
    logits = (jnp.dot(h_head, fcw_ref[...], preferred_element_type=jnp.float32)
              + fcb_ref[...])                                               # [B, C]
    out_ref[...] = jax.nn.sigmoid(logits)


def lstm_classifier_forward(text_emb, params, *, text_len, n_classes):
    """text_emb: [B, T, max_tok] float32 (batch-first LSTM input, i.e. BERT output)."""
    B, T, I = text_emb.shape
    H = params["w_hh_f"].shape[1]          # hidden size ("dimension")
    C = params["fc_w"].shape[0]            # n_classes
    assert C == n_classes

    LANE, SUB = 128, 8
    Sp = _round_up(2 * H, LANE)            # shared slab: fwd lanes [0,H), rev [H,2H)
    G = 4 * Sp                             # i|f|g|o gate slabs
    Ip = _round_up(I, LANE)
    Bp = _round_up(B, SUB)                 # sublane-aligned batch

    f32, bf16 = jnp.float32, jnp.bfloat16

    # ---- glue: pad + re-layout parameters (plain JAX, outside the kernel) ----
    x_tm = jnp.transpose(text_emb.astype(f32), (1, 0, 2))                   # [T, B, I]
    x_tm = jnp.pad(x_tm, ((0, 0), (0, Bp - B), (0, Ip - I))).astype(bf16)

    def pack_ih(w, off):      # [4H, I] -> [Ip, G], direction at lane offset `off`
        w4 = jnp.transpose(w.reshape(4, H, I), (2, 0, 1))                    # [in, gate, unit]
        w4 = jnp.pad(w4, ((0, Ip - I), (0, 0), (off, Sp - H - off)))
        return w4.reshape(Ip, G)

    def pack_hh(w, off):      # [4H, H] -> [Sp, G], block-diagonal placement
        w4 = jnp.transpose(w.reshape(4, H, H), (2, 0, 1))                    # [in_unit, gate, unit]
        w4 = jnp.pad(w4, ((off, Sp - H - off), (0, 0), (off, Sp - H - off)))
        return w4.reshape(Sp, G)

    def pack_b(b_ih, b_hh, off):   # [4H] -> [1, G]
        b = (b_ih + b_hh).reshape(4, H)
        return jnp.pad(b, ((0, 0), (off, Sp - H - off))).reshape(1, G)

    wih = jnp.concatenate([pack_ih(params["w_ih_f"], 0),
                           pack_ih(params["w_ih_r"], H)], axis=1).astype(bf16)    # [Ip, 2G]
    whh = (pack_hh(params["w_hh_f"], 0)
           + pack_hh(params["w_hh_r"], H)).astype(bf16)                            # [Sp, G]
    bias = jnp.concatenate([pack_b(params["b_ih_f"], params["b_hh_f"], 0),
                            pack_b(params["b_ih_r"], params["b_hh_r"], H)],
                           axis=1).astype(f32)                                     # [1, 2G]

    # Head weight in the SAME packed lane layout as the hidden state:
    # rows [0,H) = forward half of fc.weight, rows [H,2H) = reverse half.
    fcw = jnp.pad(params["fc_w"].astype(f32).T, ((0, Sp - 2 * H), (0, 0)))         # [Sp, C]
    fcb = params["fc_b"].reshape(1, C).astype(f32)

    # per-example lengths, clamped to [1, T] (out-of-range lengths would otherwise
    # silently capture zeros, unlike the PyTorch indexing); padded rows get 0.
    lens = jnp.asarray(text_len, jnp.int32)
    if lens.ndim == 0:
        lens = jnp.full((B,), lens, jnp.int32)
    lens = jnp.clip(lens, 1, T)
    lens = jnp.pad(lens, (0, Bp - B)).reshape(Bp, 1)

    # Gate scratch dtype: bf16 when the batch tile is bf16-sublane aligned (halves
    # scratch VMEM + store/load traffic), else f32 (bf16 tiling saves nothing at Bp=8).
    gx_dtype = bf16 if Bp % 16 == 0 else f32
    gx_bytes = T * Bp * 2 * G * jnp.dtype(gx_dtype).itemsize

    def nbytes(a):
        return a.size * a.dtype.itemsize

    needed = (sum(nbytes(a) for a in (x_tm, wih, whh, bias, fcw, fcb, lens))
              + gx_bytes + Bp * C * 4)
    vmem_limit = max(needed + needed // 2 + (4 << 20), 32 << 20)   # 1.5x + headroom
    try:
        phys = pltpu.get_tpu_info().vmem_capacity_bytes
    except Exception:
        phys = 64 << 20                                            # conservative cap
    vmem_limit = int(min(vmem_limit, phys - (8 << 20)))

    kernel = functools.partial(_bilstm_head_kernel, T=T, B=Bp, H=H, Sp=Sp, G=G)

    out = pl.pallas_call(
        kernel,
        out_shape=jax.ShapeDtypeStruct((Bp, C), jnp.float32),
        in_specs=[
            _full_spec(x_tm.shape),
            _full_spec(wih.shape),
            _full_spec(whh.shape),
            _full_spec(bias.shape),
            _full_spec(fcw.shape),
            _full_spec(fcb.shape),
            _full_spec(lens.shape),
        ],
        out_specs=_full_spec((Bp, C)),
        scratch_shapes=[pltpu.VMEM((T * Bp, 2 * G), gx_dtype)],
        compiler_params=pltpu.CompilerParams(vmem_limit_bytes=vmem_limit),
    )(x_tm, wih, whh, bias, fcw, fcb, lens)

    out = out[:B]                                   # drop padded batch rows

    # torch.squeeze(text_fea, self.n_classes): only effective when that dim exists
    # and has size 1 (i.e. n_classes == 1 in practice).
    if n_classes < out.ndim and out.shape[n_classes] == 1:
        out = jnp.squeeze(out, axis=n_classes)
    return out


def _init_params(key, max_tok, dimension, n_classes):
    """Deterministic PyTorch-shaped parameter init (uniform(-1/sqrt(H), 1/sqrt(H)))."""
    H, I, C = dimension, max_tok, n_classes
    k_lstm = 1.0 / jnp.sqrt(jnp.float32(H))
    k_fc = 1.0 / jnp.sqrt(jnp.float32(2 * H))
    keys = jax.random.split(key, 10)

    def u(k, shape, bound):
        return jax.random.uniform(k, shape, jnp.float32, -bound, bound)

    return {
        # forward direction (weight_ih_l0 / weight_hh_l0 / biases), gate order i,f,g,o
        "w_ih_f": u(keys[0], (4 * H, I), k_lstm),
        "w_hh_f": u(keys[1], (4 * H, H), k_lstm),
        "b_ih_f": u(keys[2], (4 * H,), k_lstm),
        "b_hh_f": u(keys[3], (4 * H,), k_lstm),
        # reverse direction (weight_ih_l0_reverse / ...)
        "w_ih_r": u(keys[4], (4 * H, I), k_lstm),
        "w_hh_r": u(keys[5], (4 * H, H), k_lstm),
        "b_ih_r": u(keys[6], (4 * H,), k_lstm),
        "b_hh_r": u(keys[7], (4 * H,), k_lstm),
        # fc: Linear(2*dimension, n_classes)
        "fc_w": u(keys[8], (C, 2 * H), k_fc),
        "fc_b": u(keys[9], (C,), k_fc),
    }


if __name__ == "__main__":
    # Small shapes consistent with the module:
    #   batch B=2, sequence length T=8, max_tok (LSTM input_size)=32,
    #   dimension (LSTM hidden)=32, n_classes=1, text_len=T.
    B, T = 2, 8
    max_tok, dimension, n_classes = 32, 32, 1
    text_len = T

    key = jax.random.PRNGKey(0)
    k_x, k_p = jax.random.split(key)

    # TODO(synk): the BERT encoder (self.bert) is an external pretrained model;
    # we feed a synthetic "text embedding" sequence directly to the LSTM kernel.
    text_emb = jax.random.normal(k_x, (B, T, max_tok), jnp.float32)
    params = _init_params(k_p, max_tok, dimension, n_classes)

    out = lstm_classifier_forward(text_emb, params,
                                  text_len=text_len, n_classes=n_classes)
    out = jax.block_until_ready(out)
    assert out.shape == (B,), out.shape
    assert bool(jnp.all((out >= 0.0) & (out <= 1.0)))
    print("KERNEL_OK")
</pallas_src>

<mosaic_0001>
module attributes {stable_mosaic.version = 11 : i64} {
  func.func @_bilstm_head_kernel(%arg0: memref<8x8x128xbf16, #tpu.memory_space<vmem>>, %arg1: memref<128x1024xbf16, #tpu.memory_space<vmem>>, %arg2: memref<128x512xbf16, #tpu.memory_space<vmem>>, %arg3: memref<1x1024xf32, #tpu.memory_space<vmem>>, %arg4: memref<128x1xf32, #tpu.memory_space<vmem>>, %arg5: memref<1x1xf32, #tpu.memory_space<vmem>>, %arg6: memref<8x1xi32, #tpu.memory_space<vmem>>, %arg7: memref<8x1xf32, #tpu.memory_space<vmem>>, %arg8: memref<64x1024xf32, #tpu.memory_space<vmem>>) attributes {dimension_semantics = [], scalar_prefetch = 0 : i64, scratch_operands = 1 : i64, tpu.core_type = #tpu.core_type<tc>} {
    %c0 = arith.constant 0 : index
    %c0_0 = arith.constant 0 : index
    %c0_1 = arith.constant 0 : index
    %0 = vector.load %arg0[%c0, %c0_0, %c0_1] : memref<8x8x128xbf16, #tpu.memory_space<vmem>>, vector<8x8x128xbf16>
    %1 = vector.shape_cast %0 : vector<8x8x128xbf16> to vector<64x128xbf16>
    %c0_2 = arith.constant 0 : index
    %c0_3 = arith.constant 0 : index
    %2 = vector.load %arg1[%c0_2, %c0_3] : memref<128x1024xbf16, #tpu.memory_space<vmem>>, vector<128x1024xbf16>
    %cst = arith.constant dense<0.000000e+00> : vector<64x1024xf32>
    %3 = tpu.matmul %1, %2, %cst {dimension_numbers = #tpu.dot_dimension_numbers<[1], [0], [0], [1], [0, 0, 1, 1], [], []>} : vector<64x128xbf16>, vector<128x1024xbf16>, vector<64x1024xf32> -> vector<64x1024xf32>
    %c0_4 = arith.constant 0 : index
    %c0_5 = arith.constant 0 : index
    %4 = vector.load %arg3[%c0_4, %c0_5] : memref<1x1024xf32, #tpu.memory_space<vmem>>, vector<1x1024xf32>
    %5 = vector.broadcast %4 : vector<1x1024xf32> to vector<64x1024xf32>
    %6 = arith.addf %3, %5 : vector<64x1024xf32>
    %c0_6 = arith.constant 0 : index
    %c0_7 = arith.constant 0 : index
    %7 = vector.load %arg8[%c0_6, %c0_7] : memref<64x1024xf32, #tpu.memory_space<vmem>>, vector<64x1024xf32>
    tpu.vector_store %arg8[%c0_6, %c0_7], %6 {strides = array<i32>} : memref<64x1024xf32, #tpu.memory_space<vmem>>, vector<64x1024xf32>,
    %c0_8 = arith.constant 0 : index
    %c0_9 = arith.constant 0 : index
    %8 = vector.load %arg6[%c0_8, %c0_9] : memref<8x1xi32, #tpu.memory_space<vmem>>, vector<8x1xi32>
    %cst_10 = arith.constant 0.000000e+00 : f32
    %9 = vector.broadcast %cst_10 : f32 to vector<8x128xf32>
    %c0_i32 = arith.constant 0 : i32
    %c8_i32 = arith.constant 8 : i32
    %10 = arith.muli %c0_i32, %c8_i32 : i32
    %11 = tpu.assume_multiple %10, 8 : i32
    %c7_i32 = arith.constant 7 : i32
    %12 = arith.subi %c7_i32, %c0_i32 : i32
    %c8_i32_11 = arith.constant 8 : i32
    %13 = arith.muli %12, %c8_i32_11 : i32
    %14 = tpu.assume_multiple %13, 8 : i32
    %15 = arith.index_cast %11 : i32 to index
    %c0_12 = arith.constant 0 : index
    %16 = vector.load %arg8[%15, %c0_12] : memref<64x1024xf32, #tpu.memory_space<vmem>>, vector<8x512xf32>
    %17 = arith.index_cast %14 : i32 to index
    %c512 = arith.constant 512 : index
    %18 = vector.load %arg8[%17, %c512] : memref<64x1024xf32, #tpu.memory_space<vmem>>, vector<8x512xf32>
    %19 = arith.addf %16, %18 : vector<8x512xf32>
    %20 = arith.truncf %9 : vector<8x128xf32> to vector<8x128xbf16>
    %c0_13 = arith.constant 0 : index
    %c0_14 = arith.constant 0 : index
    %21 = vector.load %arg2[%c0_13, %c0_14] : memref<128x512xbf16, #tpu.memory_space<vmem>>, vector<128x512xbf16>
    %cst_15 = arith.constant dense<0.000000e+00> : vector<8x512xf32>
    %22 = tpu.matmul %20, %21, %cst_15 {dimension_numbers = #tpu.dot_dimension_numbers<[1], [0], [0], [1], [0, 0, 1, 1], [], []>} : vector<8x128xbf16>, vector<128x512xbf16>, vector<8x512xf32> -> vector<8x512xf32>
    %23 = arith.addf %19, %22 : vector<8x512xf32>
    %24 = vector.extract_strided_slice %23 {offsets = [0, 0], sizes = [8, 128], strides = [1, 1]} : vector<8x512xf32> to vector<8x128xf32>
    %25 = arith.negf %24 : vector<8x128xf32>
    %26 = math.exp %25 : vector<8x128xf32>
    %cst_16 = arith.constant 1.000000e+00 : f32
    %27 = vector.broadcast %cst_16 : f32 to vector<8x128xf32>
    %28 = arith.addf %27, %26 : vector<8x128xf32>
    %29 = arith.divf %27, %28 : vector<8x128xf32>
    %30 = vector.extract_strided_slice %23 {offsets = [0, 128], sizes = [8, 128], strides = [1, 1]} : vector<8x512xf32> to vector<8x128xf32>
    %31 = arith.negf %30 : vector<8x128xf32>
    %32 = math.exp %31 : vector<8x128xf32>
    %cst_17 = arith.constant 1.000000e+00 : f32
    %33 = vector.broadcast %cst_17 : f32 to vector<8x128xf32>
    %34 = arith.addf %33, %32 : vector<8x128xf32>
    %35 = arith.divf %33, %34 : vector<8x128xf32>
    %36 = vector.extract_strided_slice %23 {offsets = [0, 256], sizes = [8, 128], strides = [1, 1]} : vector<8x512xf32> to vector<8x128xf32>
    %37 = math.tanh %36 : vector<8x128xf32>
    %38 = vector.extract_strided_slice %23 {offsets = [0, 384], sizes = [8, 128], strides = [1, 1]} : vector<8x512xf32> to vector<8x128xf32>
    %39 = arith.negf %38 : vector<8x128xf32>
    %40 = math.exp %39 : vector<8x128xf32>
    %cst_18 = arith.constant 1.000000e+00 : f32
    %41 = vector.broadcast %cst_18 : f32 to vector<8x128xf32>
    %42 = arith.addf %41, %40 : vector<8x128xf32>
    %43 = arith.divf %41, %42 : vector<8x128xf32>
    %44 = arith.mulf %35, %9 : vector<8x128xf32>
    %45 = arith.mulf %29, %37 : vector<8x128xf32>
    %46 = arith.addf %44, %45 : vector<8x128xf32>
    %47 = math.tanh %46 : vector<8x128xf32>
    %48 = arith.mulf %43, %47 : vector<8x128xf32>
    %c1_i32 = arith.constant 1 : i32
    %49 = arith.addi %c0_i32, %c1_i32 : i32
    %50 = vector.broadcast %49 : i32 to vector<8x1xi32>
    %51 = arith.cmpi eq, %8, %50 : vector<8x1xi32>
    %52 = vector.shape_cast %51 : vector<8x1xi1> to vector<8x1xi1>
    %53 = vector.broadcast %52 : vector<8x1xi1> to vector<8x128xi1>
    %54 = arith.select %53, %48, %9 : vector<8x128xi1>, vector<8x128xf32>
    %c1_i32_19 = arith.constant 1 : i32
    %c8_i32_20 = arith.constant 8 : i32
    %55 = arith.muli %c1_i32_19, %c8_i32_20 : i32
    %56 = tpu.assume_multiple %55, 8 : i32
    %c7_i32_21 = arith.constant 7 : i32
    %57 = arith.subi %c7_i32_21, %c1_i32_19 : i32
    %c8_i32_22 = arith.constant 8 : i32
    %58 = arith.muli %57, %c8_i32_22 : i32
    %59 = tpu.assume_multiple %58, 8 : i32
    %60 = arith.index_cast %56 : i32 to index
    %c0_23 = arith.constant 0 : index
    %61 = vector.load %arg8[%60, %c0_23] : memref<64x1024xf32, #tpu.memory_space<vmem>>, vector<8x512xf32>
    %62 = arith.index_cast %59 : i32 to index
    %c512_24 = arith.constant 512 : index
    %63 = vector.load %arg8[%62, %c512_24] : memref<64x1024xf32, #tpu.memory_space<vmem>>, vector<8x512xf32>
    %64 = arith.addf %61, %63 : vector<8x512xf32>
    %65 = arith.truncf %48 : vector<8x128xf32> to vector<8x128xbf16>
    %c0_25 = arith.constant 0 : index
    %c0_26 = arith.constant 0 : index
    %66 = vector.load %arg2[%c0_25, %c0_26] : memref<128x512xbf16, #tpu.memory_space<vmem>>, vector<128x512xbf16>
    %cst_27 = arith.constant dense<0.000000e+00> : vector<8x512xf32>
    %67 = tpu.matmul %65, %66, %cst_27 {dimension_numbers = #tpu.dot_dimension_numbers<[1], [0], [0], [1], [0, 0, 1, 1], [], []>} : vector<8x128xbf16>, vector<128x512xbf16>, vector<8x512xf32> -> vector<8x512xf32>
    %68 = arith.addf %64, %67 : vector<8x512xf32>
    %69 = vector.extract_strided_slice %68 {offsets = [0, 0], sizes = [8, 128], strides = [1, 1]} : vector<8x512xf32> to vector<8x128xf32>
    %70 = arith.negf %69 : vector<8x128xf32>
    %71 = math.exp %70 : vector<8x128xf32>
    %cst_28 = arith.constant 1.000000e+00 : f32
    %72 = vector.broadcast %cst_28 : f32 to vector<8x128xf32>
    %73 = arith.addf %72, %71 : vector<8x128xf32>
    %74 = arith.divf %72, %73 : vector<8x128xf32>
    %75 = vector.extract_strided_slice %68 {offsets = [0, 128], sizes = [8, 128], strides = [1, 1]} : vector<8x512xf32> to vector<8x128xf32>
    %76 = arith.negf %75 : vector<8x128xf32>
    %77 = math.exp %76 : vector<8x128xf32>
    %cst_29 = arith.constant 1.000000e+00 : f32
    %78 = vector.broadcast %cst_29 : f32 to vector<8x128xf32>
    %79 = arith.addf %78, %77 : vector<8x128xf32>
    %80 = arith.divf %78, %79 : vector<8x128xf32>
    %81 = vector.extract_strided_slice %68 {offsets = [0, 256], sizes = [8, 128], strides = [1, 1]} : vector<8x512xf32> to vector<8x128xf32>
    %82 = math.tanh %81 : vector<8x128xf32>
    %83 = vector.extract_strided_slice %68 {offsets = [0, 384], sizes = [8, 128], strides = [1, 1]} : vector<8x512xf32> to vector<8x128xf32>
    %84 = arith.negf %83 : vector<8x128xf32>
    %85 = math.exp %84 : vector<8x128xf32>
    %cst_30 = arith.constant 1.000000e+00 : f32
    %86 = vector.broadcast %cst_30 : f32 to vector<8x128xf32>
    %87 = arith.addf %86, %85 : vector<8x128xf32>
    %88 = arith.divf %86, %87 : vector<8x128xf32>
    %89 = arith.mulf %80, %46 : vector<8x128xf32>
    %90 = arith.mulf %74, %82 : vector<8x128xf32>
    %91 = arith.addf %89, %90 : vector<8x128xf32>
    %92 = math.tanh %91 : vector<8x128xf32>
    %93 = arith.mulf %88, %92 : vector<8x128xf32>
    %c1_i32_31 = arith.constant 1 : i32
    %94 = arith.addi %c1_i32_19, %c1_i32_31 : i32
    %95 = vector.broadcast %94 : i32 to vector<8x1xi32>
    %96 = arith.cmpi eq, %8, %95 : vector<8x1xi32>
    %97 = vector.shape_cast %96 : vector<8x1xi1> to vector<8x1xi1>
    %98 = vector.broadcast %97 : vector<8x1xi1> to vector<8x128xi1>
    %99 = arith.select %98, %93, %54 : vector<8x128xi1>, vector<8x128xf32>
    %c2_i32 = arith.constant 2 : i32
    %c8_i32_32 = arith.constant 8 : i32
    %100 = arith.muli %c2_i32, %c8_i32_32 : i32
    %101 = tpu.assume_multiple %100, 8 : i32
    %c7_i32_33 = arith.constant 7 : i32
    %102 = arith.subi %c7_i32_33, %c2_i32 : i32
    %c8_i32_34 = arith.constant 8 : i32
    %103 = arith.muli %102, %c8_i32_34 : i32
    %104 = tpu.assume_multiple %103, 8 : i32
    %105 = arith.index_cast %101 : i32 to index
    %c0_35 = arith.constant 0 : index
    %106 = vector.load %arg8[%105, %c0_35] : memref<64x1024xf32, #tpu.memory_space<vmem>>, vector<8x512xf32>
    %107 = arith.index_cast %104 : i32 to index
    %c512_36 = arith.constant 512 : index
    %108 = vector.load %arg8[%107, %c512_36] : memref<64x1024xf32, #tpu.memory_space<vmem>>, vector<8x512xf32>
    %109 = arith.addf %106, %108 : vector<8x512xf32>
    %110 = arith.truncf %93 : vector<8x128xf32> to vector<8x128xbf16>
    %c0_37 = arith.constant 0 : index
    %c0_38 = arith.constant 0 : index
    %111 = vector.load %arg2[%c0_37, %c0_38] : memref<128x512xbf16, #tpu.memory_space<vmem>>, vector<128x512xbf16>
    %cst_39 = arith.constant dense<0.000000e+00> : vector<8x512xf32>
    %112 = tpu.matmul %110, %111, %cst_39 {dimension_numbers = #tpu.dot_dimension_numbers<[1], [0], [0], [1], [0, 0, 1, 1], [], []>} : vector<8x128xbf16>, vector<128x512xbf16>, vector<8x512xf32> -> vector<8x512xf32>
    %113 = arith.addf %109, %112 : vector<8x512xf32>
    %114 = vector.extract_strided_slice %113 {offsets = [0, 0], sizes = [8, 128], strides = [1, 1]} : vector<8x512xf32> to vector<8x128xf32>
    %115 = arith.negf %114 : vector<8x128xf32>
    %116 = math.exp %115 : vector<8x128xf32>
    %cst_40 = arith.constant 1.000000e+00 : f32
    %117 = vector.broadcast %cst_40 : f32 to vector<8x128xf32>
    %118 = arith.addf %117, %116 : vector<8x128xf32>
    %119 = arith.divf %117, %118 : vector<8x128xf32>
    %120 = vector.extract_strided_slice %113 {offsets = [0, 128], sizes = [8, 128], strides = [1, 1]} : vector<8x512xf32> to vector<8x128xf32>
    %121 = arith.negf %120 : vector<8x128xf32>
    %122 = math.exp %121 : vector<8x128xf32>
    %cst_41 = arith.constant 1.000000e+00 : f32
    %123 = vector.broadcast %cst_41 : f32 to vector<8x128xf32>
    %124 = arith.addf %123, %122 : vector<8x128xf32>
    %125 = arith.divf %123, %124 : vector<8x128xf32>
    %126 = vector.extract_strided_slice %113 {offsets = [0, 256], sizes = [8, 128], strides = [1, 1]} : vector<8x512xf32> to vector<8x128xf32>
    %127 = math.tanh %126 : vector<8x128xf32>
    %128 = vector.extract_strided_slice %113 {offsets = [0, 384], sizes = [8, 128], strides = [1, 1]} : vector<8x512xf32> to vector<8x128xf32>
    %129 = arith.negf %128 : vector<8x128xf32>
    %130 = math.exp %129 : vector<8x128xf32>
    %cst_42 = arith.constant 1.000000e+00 : f32
    %131 = vector.broadcast %cst_42 : f32 to vector<8x128xf32>
    %132 = arith.addf %131, %130 : vector<8x128xf32>
    %133 = arith.divf %131, %132 : vector<8x128xf32>
    %134 = arith.mulf %125, %91 : vector<8x128xf32>
    %135 = arith.mulf %119, %127 : vector<8x128xf32>
    %136 = arith.addf %134, %135 : vector<8x128xf32>
    %137 = math.tanh %136 : vector<8x128xf32>
    %138 = arith.mulf %133, %137 : vector<8x128xf32>
    %c1_i32_43 = arith.constant 1 : i32
    %139 = arith.addi %c2_i32, %c1_i32_43 : i32
    %140 = vector.broadcast %139 : i32 to vector<8x1xi32>
    %141 = arith.cmpi eq, %8, %140 : vector<8x1xi32>
    %142 = vector.shape_cast %141 : vector<8x1xi1> to vector<8x1xi1>
    %143 = vector.broadcast %142 : vector<8x1xi1> to vector<8x128xi1>
    %144 = arith.select %143, %138, %99 : vector<8x128xi1>, vector<8x128xf32>
    %c3_i32 = arith.constant 3 : i32
    %c8_i32_44 = arith.constant 8 : i32
    %145 = arith.muli %c3_i32, %c8_i32_44 : i32
    %146 = tpu.assume_multiple %145, 8 : i32
    %c7_i32_45 = arith.constant 7 : i32
    %147 = arith.subi %c7_i32_45, %c3_i32 : i32
    %c8_i32_46 = arith.constant 8 : i32
    %148 = arith.muli %147, %c8_i32_46 : i32
    %149 = tpu.assume_multiple %148, 8 : i32
    %150 = arith.index_cast %146 : i32 to index
    %c0_47 = arith.constant 0 : index
    %151 = vector.load %arg8[%150, %c0_47] : memref<64x1024xf32, #tpu.memory_space<vmem>>, vector<8x512xf32>
    %152 = arith.index_cast %149 : i32 to index
    %c512_48 = arith.constant 512 : index
    %153 = vector.load %arg8[%152, %c512_48] : memref<64x1024xf32, #tpu.memory_space<vmem>>, vector<8x512xf32>
    %154 = arith.addf %151, %153 : vector<8x512xf32>
    %155 = arith.truncf %138 : vector<8x128xf32> to vector<8x128xbf16>
    %c0_49 = arith.constant 0 : index
    %c0_50 = arith.constant 0 : index
    %156 = vector.load %arg2[%c0_49, %c0_50] : memref<128x512xbf16, #tpu.memory_space<vmem>>, vector<128x512xbf16>
    %cst_51 = arith.constant dense<0.000000e+00> : vector<8x512xf32>
    %157 = tpu.matmul %155, %156, %cst_51 {dimension_numbers = #tpu.dot_dimension_numbers<[1], [0], [0], [1], [0, 0, 1, 1], [], []>} : vector<8x128xbf16>, vector<128x512xbf16>, vector<8x512xf32> -> vector<8x512xf32>
    %158 = arith.addf %154, %157 : vector<8x512xf32>
    %159 = vector.extract_strided_slice %158 {offsets = [0, 0], sizes = [8, 128], strides = [1, 1]} : vector<8x512xf32> to vector<8x128xf32>
    %160 = arith.negf %159 : vector<8x128xf32>
    %161 = math.exp %160 : vector<8x128xf32>
    %cst_52 = arith.constant 1.000000e+00 : f32
    %162 = vector.broadcast %cst_52 : f32 to vector<8x128xf32>
    %163 = arith.addf %162, %161 : vector<8x128xf32>
    %164 = arith.divf %162, %163 : vector<8x128xf32>
    %165 = vector.extract_strided_slice %158 {offsets = [0, 128], sizes = [8, 128], strides = [1, 1]} : vector<8x512xf32> to vector<8x128xf32>
    %166 = arith.negf %165 : vector<8x128xf32>
    %167 = math.exp %166 : vector<8x128xf32>
    %cst_53 = arith.constant 1.000000e+00 : f32
    %168 = vector.broadcast %cst_53 : f32 to vector<8x128xf32>
    %169 = arith.addf %168, %167 : vector<8x128xf32>
    %170 = arith.divf %168, %169 : vector<8x128xf32>
    %171 = vector.extract_strided_slice %158 {offsets = [0, 256], sizes = [8, 128], strides = [1, 1]} : vector<8x512xf32> to vector<8x128xf32>
    %172 = math.tanh %171 : vector<8x128xf32>
    %173 = vector.extract_strided_slice %158 {offsets = [0, 384], sizes = [8, 128], strides = [1, 1]} : vector<8x512xf32> to vector<8x128xf32>
    %174 = arith.negf %173 : vector<8x128xf32>
    %175 = math.exp %174 : vector<8x128xf32>
    %cst_54 = arith.constant 1.000000e+00 : f32
    %176 = vector.broadcast %cst_54 : f32 to vector<8x128xf32>
    %177 = arith.addf %176, %175 : vector<8x128xf32>
    %178 = arith.divf %176, %177 : vector<8x128xf32>
    %179 = arith.mulf %170, %136 : vector<8x128xf32>
    %180 = arith.mulf %164, %172 : vector<8x128xf32>
    %181 = arith.addf %179, %180 : vector<8x128xf32>
    %182 = math.tanh %181 : vector<8x128xf32>
    %183 = arith.mulf %178, %182 : vector<8x128xf32>
    %c1_i32_55 = arith.constant 1 : i32
    %184 = arith.addi %c3_i32, %c1_i32_55 : i32
    %185 = vector.broadcast %184 : i32 to vector<8x1xi32>
    %186 = arith.cmpi eq, %8, %185 : vector<8x1xi32>
    %187 = vector.shape_cast %186 : vector<8x1xi1> to vector<8x1xi1>
    %188 = vector.broadcast %187 : vector<8x1xi1> to vector<8x128xi1>
    %189 = arith.select %188, %183, %144 : vector<8x128xi1>, vector<8x128xf32>
    %c4_i32 = arith.constant 4 : i32
    %c8_i32_56 = arith.constant 8 : i32
    %190 = arith.muli %c4_i32, %c8_i32_56 : i32
    %191 = tpu.assume_multiple %190, 8 : i32
    %c7_i32_57 = arith.constant 7 : i32
    %192 = arith.subi %c7_i32_57, %c4_i32 : i32
    %c8_i32_58 = arith.constant 8 : i32
    %193 = arith.muli %192, %c8_i32_58 : i32
    %194 = tpu.assume_multiple %193, 8 : i32
    %195 = arith.index_cast %191 : i32 to index
    %c0_59 = arith.constant 0 : index
    %196 = vector.load %arg8[%195, %c0_59] : memref<64x1024xf32, #tpu.memory_space<vmem>>, vector<8x512xf32>
    %197 = arith.index_cast %194 : i32 to index
    %c512_60 = arith.constant 512 : index
    %198 = vector.load %arg8[%197, %c512_60] : memref<64x1024xf32, #tpu.memory_space<vmem>>, vector<8x512xf32>
    %199 = arith.addf %196, %198 : vector<8x512xf32>
    %200 = arith.truncf %183 : vector<8x128xf32> to vector<8x128xbf16>
    %c0_61 = arith.constant 0 : index
    %c0_62 = arith.constant 0 : index
    %201 = vector.load %arg2[%c0_61, %c0_62] : memref<128x512xbf16, #tpu.memory_space<vmem>>, vector<128x512xbf16>
    %cst_63 = arith.constant dense<0.000000e+00> : vector<8x512xf32>
    %202 = tpu.matmul %200, %201, %cst_63 {dimension_numbers = #tpu.dot_dimension_numbers<[1], [0], [0], [1], [0, 0, 1, 1], [], []>} : vector<8x128xbf16>, vector<128x512xbf16>, vector<8x512xf32> -> vector<8x512xf32>
    %203 = arith.addf %199, %202 : vector<8x512xf32>
    %204 = vector.extract_strided_slice %203 {offsets = [0, 0], sizes = [8, 128], strides = [1, 1]} : vector<8x512xf32> to vector<8x128xf32>
    %205 = arith.negf %204 : vector<8x128xf32>
    %206 = math.exp %205 : vector<8x128xf32>
    %cst_64 = arith.constant 1.000000e+00 : f32
    %207 = vector.broadcast %cst_64 : f32 to vector<8x128xf32>
    %208 = arith.addf %207, %206 : vector<8x128xf32>
    %209 = arith.divf %207, %208 : vector<8x128xf32>
    %210 = vector.extract_strided_slice %203 {offsets = [0, 128], sizes = [8, 128], strides = [1, 1]} : vector<8x512xf32> to vector<8x128xf32>
    %211 = arith.negf %210 : vector<8x128xf32>
    %212 = math.exp %211 : vector<8x128xf32>
    %cst_65 = arith.constant 1.000000e+00 : f32
    %213 = vector.broadcast %cst_65 : f32 to vector<8x128xf32>
    %214 = arith.addf %213, %212 : vector<8x128xf32>
    %215 = arith.divf %213, %214 : vector<8x128xf32>
    %216 = vector.extract_strided_slice %203 {offsets = [0, 256], sizes = [8, 128], strides = [1, 1]} : vector<8x512xf32> to vector<8x128xf32>
    %217 = math.tanh %216 : vector<8x128xf32>
    %218 = vector.extract_strided_slice %203 {offsets = [0, 384], sizes = [8, 128], strides = [1, 1]} : vector<8x512xf32> to vector<8x128xf32>
    %219 = arith.negf %218 : vector<8x128xf32>
    %220 = math.exp %219 : vector<8x128xf32>
    %cst_66 = arith.constant 1.000000e+00 : f32
    %221 = vector.broadcast %cst_66 : f32 to vector<8x128xf32>
    %222 = arith.addf %221, %220 : vector<8x128xf32>
    %223 = arith.divf %221, %222 : vector<8x128xf32>
    %224 = arith.mulf %215, %181 : vector<8x128xf32>
    %225 = arith.mulf %209, %217 : vector<8x128xf32>
    %226 = arith.addf %224, %225 : vector<8x128xf32>
    %227 = math.tanh %226 : vector<8x128xf32>
    %228 = arith.mulf %223, %227 : vector<8x128xf32>
    %c1_i32_67 = arith.constant 1 : i32
    %229 = arith.addi %c4_i32, %c1_i32_67 : i32
    %230 = vector.broadcast %229 : i32 to vector<8x1xi32>
    %231 = arith.cmpi eq, %8, %230 : vector<8x1xi32>
    %232 = vector.shape_cast %231 : vector<8x1xi1> to vector<8x1xi1>
    %233 = vector.broadcast %232 : vector<8x1xi1> to vector<8x128xi1>
    %234 = arith.select %233, %228, %189 : vector<8x128xi1>, vector<8x128xf32>
    %c5_i32 = arith.constant 5 : i32
    %c8_i32_68 = arith.constant 8 : i32
    %235 = arith.muli %c5_i32, %c8_i32_68 : i32
    %236 = tpu.assume_multiple %235, 8 : i32
    %c7_i32_69 = arith.constant 7 : i32
    %237 = arith.subi %c7_i32_69, %c5_i32 : i32
    %c8_i32_70 = arith.constant 8 : i32
    %238 = arith.muli %237, %c8_i32_70 : i32
    %239 = tpu.assume_multiple %238, 8 : i32
    %240 = arith.index_cast %236 : i32 to index
    %c0_71 = arith.constant 0 : index
    %241 = vector.load %arg8[%240, %c0_71] : memref<64x1024xf32, #tpu.memory_space<vmem>>, vector<8x512xf32>
    %242 = arith.index_cast %239 : i32 to index
    %c512_72 = arith.constant 512 : index
    %243 = vector.load %arg8[%242, %c512_72] : memref<64x1024xf32, #tpu.memory_space<vmem>>, vector<8x512xf32>
    %244 = arith.addf %241, %243 : vector<8x512xf32>
    %245 = arith.truncf %228 : vector<8x128xf32> to vector<8x128xbf16>
    %c0_73 = arith.constant 0 : index
    %c0_74 = arith.constant 0 : index
    %246 = vector.load %arg2[%c0_73, %c0_74] : memref<128x512xbf16, #tpu.memory_space<vmem>>, vector<128x512xbf16>
    %cst_75 = arith.constant dense<0.000000e+00> : vector<8x512xf32>
    %247 = tpu.matmul %245, %246, %cst_75 {dimension_numbers = #tpu.dot_dimension_numbers<[1], [0], [0], [1], [0, 0, 1, 1], [], []>} : vector<8x128xbf16>, vector<128x512xbf16>, vector<8x512xf32> -> vector<8x512xf32>
    %248 = arith.addf %244, %247 : vector<8x512xf32>
    %249 = vector.extract_strided_slice %248 {offsets = [0, 0], sizes = [8, 128], strides = [1, 1]} : vector<8x512xf32> to vector<8x128xf32>
    %250 = arith.negf %249 : vector<8x128xf32>
    %251 = math.exp %250 : vector<8x128xf32>
    %cst_76 = arith.constant 1.000000e+00 : f32
    %252 = vector.broadcast %cst_76 : f32 to vector<8x128xf32>
    %253 = arith.addf %252, %251 : vector<8x128xf32>
    %254 = arith.divf %252, %253 : vector<8x128xf32>
    %255 = vector.extract_strided_slice %248 {offsets = [0, 128], sizes = [8, 128], strides = [1, 1]} : vector<8x512xf32> to vector<8x128xf32>
    %256 = arith.negf %255 : vector<8x128xf32>
    %257 = math.exp %256 : vector<8x128xf32>
    %cst_77 = arith.constant 1.000000e+00 : f32
    %258 = vector.broadcast %cst_77 : f32 to vector<8x128xf32>
    %259 = arith.addf %258, %257 : vector<8x128xf32>
    %260 = arith.divf %258, %259 : vector<8x128xf32>
    %261 = vector.extract_strided_slice %248 {offsets = [0, 256], sizes = [8, 128], strides = [1, 1]} : vector<8x512xf32> to vector<8x128xf32>
    %262 = math.tanh %261 : vector<8x128xf32>
    %263 = vector.extract_strided_slice %248 {offsets = [0, 384], sizes = [8, 128], strides = [1, 1]} : vector<8x512xf32> to vector<8x128xf32>
    %264 = arith.negf %263 : vector<8x128xf32>
    %265 = math.exp %264 : vector<8x128xf32>
    %cst_78 = arith.constant 1.000000e+00 : f32
    %266 = vector.broadcast %cst_78 : f32 to vector<8x128xf32>
    %267 = arith.addf %266, %265 : vector<8x128xf32>
    %268 = arith.divf %266, %267 : vector<8x128xf32>
    %269 = arith.mulf %260, %226 : vector<8x128xf32>
    %270 = arith.mulf %254, %262 : vector<8x128xf32>
    %271 = arith.addf %269, %270 : vector<8x128xf32>
    %272 = math.tanh %271 : vector<8x128xf32>
    %273 = arith.mulf %268, %272 : vector<8x128xf32>
    %c1_i32_79 = arith.constant 1 : i32
    %274 = arith.addi %c5_i32, %c1_i32_79 : i32
    %275 = vector.broadcast %274 : i32 to vector<8x1xi32>
    %276 = arith.cmpi eq, %8, %275 : vector<8x1xi32>
    %277 = vector.shape_cast %276 : vector<8x1xi1> to vector<8x1xi1>
    %278 = vector.broadcast %277 : vector<8x1xi1> to vector<8x128xi1>
    %279 = arith.select %278, %273, %234 : vector<8x128xi1>, vector<8x128xf32>
    %c6_i32 = arith.constant 6 : i32
    %c8_i32_80 = arith.constant 8 : i32
    %280 = arith.muli %c6_i32, %c8_i32_80 : i32
    %281 = tpu.assume_multiple %280, 8 : i32
    %c7_i32_81 = arith.constant 7 : i32
    %282 = arith.subi %c7_i32_81, %c6_i32 : i32
    %c8_i32_82 = arith.constant 8 : i32
    %283 = arith.muli %282, %c8_i32_82 : i32
    %284 = tpu.assume_multiple %283, 8 : i32
    %285 = arith.index_cast %281 : i32 to index
    %c0_83 = arith.constant 0 : index
    %286 = vector.load %arg8[%285, %c0_83] : memref<64x1024xf32, #tpu.memory_space<vmem>>, vector<8x512xf32>
    %287 = arith.index_cast %284 : i32 to index
    %c512_84 = arith.constant 512 : index
    %288 = vector.load %arg8[%287, %c512_84] : memref<64x1024xf32, #tpu.memory_space<vmem>>, vector<8x512xf32>
    %289 = arith.addf %286, %288 : vector<8x512xf32>
    %290 = arith.truncf %273 : vector<8x128xf32> to vector<8x128xbf16>
    %c0_85 = arith.constant 0 : index
    %c0_86 = arith.constant 0 : index
    %291 = vector.load %arg2[%c0_85, %c0_86] : memref<128x512xbf16, #tpu.memory_space<vmem>>, vector<128x512xbf16>
    %cst_87 = arith.constant dense<0.000000e+00> : vector<8x512xf32>
    %292 = tpu.matmul %290, %291, %cst_87 {dimension_numbers = #tpu.dot_dimension_numbers<[1], [0], [0], [1], [0, 0, 1, 1], [], []>} : vector<8x128xbf16>, vector<128x512xbf16>, vector<8x512xf32> -> vector<8x512xf32>
    %293 = arith.addf %289, %292 : vector<8x512xf32>
    %294 = vector.extract_strided_slice %293 {offsets = [0, 0], sizes = [8, 128], strides = [1, 1]} : vector<8x512xf32> to vector<8x128xf32>
    %295 = arith.negf %294 : vector<8x128xf32>
    %296 = math.exp %295 : vector<8x128xf32>
    %cst_88 = arith.constant 1.000000e+00 : f32
    %297 = vector.broadcast %cst_88 : f32 to vector<8x128xf32>
    %298 = arith.addf %297, %296 : vector<8x128xf32>
    %299 = arith.divf %297, %298 : vector<8x128xf32>
    %300 = vector.extract_strided_slice %293 {offsets = [0, 128], sizes = [8, 128], strides = [1, 1]} : vector<8x512xf32> to vector<8x128xf32>
    %301 = arith.negf %300 : vector<8x128xf32>
    %302 = math.exp %301 : vector<8x128xf32>
    %cst_89 = arith.constant 1.000000e+00 : f32
    %303 = vector.broadcast %cst_89 : f32 to vector<8x128xf32>
    %304 = arith.addf %303, %302 : vector<8x128xf32>
    %305 = arith.divf %303, %304 : vector<8x128xf32>
    %306 = vector.extract_strided_slice %293 {offsets = [0, 256], sizes = [8, 128], strides = [1, 1]} : vector<8x512xf32> to vector<8x128xf32>
    %307 = math.tanh %306 : vector<8x128xf32>
    %308 = vector.extract_strided_slice %293 {offsets = [0, 384], sizes = [8, 128], strides = [1, 1]} : vector<8x512xf32> to vector<8x128xf32>
    %309 = arith.negf %308 : vector<8x128xf32>
    %310 = math.exp %309 : vector<8x128xf32>
    %cst_90 = arith.constant 1.000000e+00 : f32
    %311 = vector.broadcast %cst_90 : f32 to vector<8x128xf32>
    %312 = arith.addf %311, %310 : vector<8x128xf32>
    %313 = arith.divf %311, %312 : vector<8x128xf32>
    %314 = arith.mulf %305, %271 : vector<8x128xf32>
    %315 = arith.mulf %299, %307 : vector<8x128xf32>
    %316 = arith.addf %314, %315 : vector<8x128xf32>
    %317 = math.tanh %316 : vector<8x128xf32>
    %318 = arith.mulf %313, %317 : vector<8x128xf32>
    %c1_i32_91 = arith.constant 1 : i32
    %319 = arith.addi %c6_i32, %c1_i32_91 : i32
    %320 = vector.broadcast %319 : i32 to vector<8x1xi32>
    %321 = arith.cmpi eq, %8, %320 : vector<8x1xi32>
    %322 = vector.shape_cast %321 : vector<8x1xi1> to vector<8x1xi1>
    %323 = vector.broadcast %322 : vector<8x1xi1> to vector<8x128xi1>
    %324 = arith.select %323, %318, %279 : vector<8x128xi1>, vector<8x128xf32>
    %c7_i32_92 = arith.constant 7 : i32
    %c8_i32_93 = arith.constant 8 : i32
    %325 = arith.muli %c7_i32_92, %c8_i32_93 : i32
    %326 = tpu.assume_multiple %325, 8 : i32
    %c7_i32_94 = arith.constant 7 : i32
    %327 = arith.subi %c7_i32_94, %c7_i32_92 : i32
    %c8_i32_95 = arith.constant 8 : i32
    %328 = arith.muli %327, %c8_i32_95 : i32
    %329 = tpu.assume_multiple %328, 8 : i32
    %330 = arith.index_cast %326 : i32 to index
    %c0_96 = arith.constant 0 : index
    %331 = vector.load %arg8[%330, %c0_96] : memref<64x1024xf32, #tpu.memory_space<vmem>>, vector<8x512xf32>
    %332 = arith.index_cast %329 : i32 to index
    %c512_97 = arith.constant 512 : index
    %333 = vector.load %arg8[%332, %c512_97] : memref<64x1024xf32, #tpu.memory_space<vmem>>, vector<8x512xf32>
    %334 = arith.addf %331, %333 : vector<8x512xf32>
    %335 = arith.truncf %318 : vector<8x128xf32> to vector<8x128xbf16>
    %c0_98 = arith.constant 0 : index
    %c0_99 = arith.constant 0 : index
    %336 = vector.load %arg2[%c0_98, %c0_99] : memref<128x512xbf16, #tpu.memory_space<vmem>>, vector<128x512xbf16>
    %cst_100 = arith.constant dense<0.000000e+00> : vector<8x512xf32>
    %337 = tpu.matmul %335, %336, %cst_100 {dimension_numbers = #tpu.dot_dimension_numbers<[1], [0], [0], [1], [0, 0, 1, 1], [], []>} : vector<8x128xbf16>, vector<128x512xbf16>, vector<8x512xf32> -> vector<8x512xf32>
    %338 = arith.addf %334, %337 : vector<8x512xf32>
    %339 = vector.extract_strided_slice %338 {offsets = [0, 0], sizes = [8, 128], strides = [1, 1]} : vector<8x512xf32> to vector<8x128xf32>
    %340 = arith.negf %339 : vector<8x128xf32>
    %341 = math.exp %340 : vector<8x128xf32>
    %cst_101 = arith.constant 1.000000e+00 : f32
    %342 = vector.broadcast %cst_101 : f32 to vector<8x128xf32>
    %343 = arith.addf %342, %341 : vector<8x128xf32>
    %344 = arith.divf %342, %343 : vector<8x128xf32>
    %345 = vector.extract_strided_slice %338 {offsets = [0, 128], sizes = [8, 128], strides = [1, 1]} : vector<8x512xf32> to vector<8x128xf32>
    %346 = arith.negf %345 : vector<8x128xf32>
    %347 = math.exp %346 : vector<8x128xf32>
    %cst_102 = arith.constant 1.000000e+00 : f32
    %348 = vector.broadcast %cst_102 : f32 to vector<8x128xf32>
    %349 = arith.addf %348, %347 : vector<8x128xf32>
    %350 = arith.divf %348, %349 : vector<8x128xf32>
    %351 = vector.extract_strided_slice %338 {offsets = [0, 256], sizes = [8, 128], strides = [1, 1]} : vector<8x512xf32> to vector<8x128xf32>
    %352 = math.tanh %351 : vector<8x128xf32>
    %353 = vector.extract_strided_slice %338 {offsets = [0, 384], sizes = [8, 128], strides = [1, 1]} : vector<8x512xf32> to vector<8x128xf32>
    %354 = arith.negf %353 : vector<8x128xf32>
    %355 = math.exp %354 : vector<8x128xf32>
    %cst_103 = arith.constant 1.000000e+00 : f32
    %356 = vector.broadcast %cst_103 : f32 to vector<8x128xf32>
    %357 = arith.addf %356, %355 : vector<8x128xf32>
    %358 = arith.divf %356, %357 : vector<8x128xf32>
    %359 = arith.mulf %350, %316 : vector<8x128xf32>
    %360 = arith.mulf %344, %352 : vector<8x128xf32>
    %361 = arith.addf %359, %360 : vector<8x128xf32>
    %362 = math.tanh %361 : vector<8x128xf32>
    %363 = arith.mulf %358, %362 : vector<8x128xf32>
    %c1_i32_104 = arith.constant 1 : i32
    %364 = arith.addi %c7_i32_92, %c1_i32_104 : i32
    %365 = vector.broadcast %364 : i32 to vector<8x1xi32>
    %366 = arith.cmpi eq, %8, %365 : vector<8x1xi32>
    %367 = vector.shape_cast %366 : vector<8x1xi1> to vector<8x1xi1>
    %368 = vector.broadcast %367 : vector<8x1xi1> to vector<8x128xi1>
    %369 = arith.select %368, %363, %324 : vector<8x128xi1>, vector<8x128xf32>
    %c8_i32_105 = arith.constant 8 : i32
    %370 = tpu.iota {dimensions = array<i32: 1>} : vector<8x128xi32>
    %c32_i32 = arith.constant 32 : i32
    %371 = vector.broadcast %c32_i32 : i32 to vector<8x128xi32>
    %372 = arith.cmpi slt, %370, %371 : vector<8x128xi32>
    %373 = arith.select %372, %369, %363 : vector<8x128xi1>, vector<8x128xf32>
    %c0_106 = arith.constant 0 : index
    %c0_107 = arith.constant 0 : index
    %374 = vector.load %arg4[%c0_106, %c0_107] : memref<128x1xf32, #tpu.memory_space<vmem>>, vector<128x1xf32>
    %cst_108 = arith.constant dense<0.000000e+00> : vector<8x1xf32>
    %375 = tpu.matmul %373, %374, %cst_108 {dimension_numbers = #tpu.dot_dimension_numbers<[1], [0], [0], [1], [0, 0, 1, 1], [], []>} : vector<8x128xf32>, vector<128x1xf32>, vector<8x1xf32> -> vector<8x1xf32>
    %c0_109 = arith.constant 0 : index
    %c0_110 = arith.constant 0 : index
    %376 = vector.load %arg5[%c0_109, %c0_110] : memref<1x1xf32, #tpu.memory_space<vmem>>, vector<1x1xf32>
    %377 = vector.broadcast %376 : vector<1x1xf32> to vector<8x1xf32>
    %378 = arith.addf %375, %377 : vector<8x1xf32>
    %379 = arith.negf %378 : vector<8x1xf32>
    %380 = math.exp %379 : vector<8x1xf32>
    %cst_111 = arith.constant 1.000000e+00 : f32
    %381 = vector.broadcast %cst_111 : f32 to vector<8x1xf32>
    %382 = arith.addf %381, %380 : vector<8x1xf32>
    %383 = arith.divf %381, %382 : vector<8x1xf32>
    %c0_112 = arith.constant 0 : index
    %c0_113 = arith.constant 0 : index
    %384 = vector.load %arg7[%c0_112, %c0_113] : memref<8x1xf32, #tpu.memory_space<vmem>>, vector<8x1xf32>
    tpu.vector_store %arg7[%c0_112, %c0_113], %383 {strides = array<i32>} : memref<8x1xf32, #tpu.memory_space<vmem>>, vector<8x1xf32>,
    return
  }
}

</mosaic_0001>

<bundles_post_ra>
// kernel: tpu_custom_call.1
= control target key start
LH: loop header
LB: loop body
LE: loop exit
PB: predicated region body
PF: predicated region fallthrough
CT: control target
= control target key end

     0   :  { %s3646_s0 = inlined_call_operand.vmem [shape: bf16[8,8,128], index: 0, kind: input, shape index: {}]   ;;  %s3647_s1 = inlined_call_operand.hbm [shape: bf16[128,1024], index: 1, kind: input, shape index: {}]   ;;  %s3648_s2 = inlined_call_operand.hbm [shape: bf16[128,512], index: 2, kind: input, shape index: {}]   ;;  %s3649_s3 = inlined_call_operand.vmem [shape: f32[1,1024], index: 3, kind: input, shape index: {}]   ;;  %s3650_s4 = inlined_call_operand.vmem [shape: f32[128,1], index: 4, kind: input, shape index: {}]   ;;  %s3651_s5 = inlined_call_operand.<no memory space> [shape: f32[1,1], index: 5, kind: input, shape index: {}]   ;;  %s3652_s6 = inlined_call_operand.vmem [shape: s32[8,1], index: 6, kind: input, shape index: {}]   ;;  %s3653_s7 = inlined_call_operand.vmem [shape: f32[8,1], index: 7, kind: output, shape index: {}]  }
   0x1   :  { %v12_v0 = vstv %s3651_s5 }
   0x2   :  { %13 = vst [vmem:[#allocation3] sm:$0x1] %v12_v0 }
   0x3   :  { %14 = vsyncpa [#allocation5], 0 }
   0x4   :  { %15 = vsyncpa [#allocation7], 0  ;;  %s2724_s26 = smov [#allocation4]   ;;  %s2676_s30 = scalar_lea.hbm %s3647_s1, 8192 }
   0x5   :  { %s23_s27 = sshll.u32 %s2724_s26, 4  ;;  %p2677_p0 = scmp.ne.s32.totalorder %s3647_s1, %s2676_s30  ;;  %s24_s27 = int_to_ptr.vmem [resolvable:$true] %s23_s27 }
   0x6   :  { %p2680_p1 = scmp.lt.u32.totalorder %s2676_s30, %s3647_s1 }
   0x8   :  { %p2682_p2 = pnand %p2680_p1, %p2677_p0 }
   0xa   :  { %2685 = shalt.err (!%p2682_p2)
}
   0xb   :  { %s2686_s5 = scalar_lea.vmem %s24_s27, 8192  ;;  %p2691_p4 = scmp.lt.s32.totalorder %s24_s27, %s24_s27 }
   0xc   :  { %p2687_p3 = scmp.ne.s32.totalorder %s24_s27, %s2686_s5  ;;  %p2692_p5 = scmp.lt.s32.totalorder %s2686_s5, %s2686_s5 }
   0xe   :  { %p2693_p6 = por %p2692_p5, %p2691_p4 }
  0x10   :  { %p2694_p7 = pnand %p2693_p6, %p2687_p3 }
  0x12   :  { %2697 = shalt.err (!%p2694_p7)
}
  0x13   :  { %s2725_s12 = smov 512   ;;  %s2726_s13 = smov 32  }
  0x14   :  { %29 = dma.hbm_to_vmem [thread:$0]  %s3647_s1, 8192, %s24_s27, [#allocation5], %s2725_s12, %s2725_s12, %s2726_s13  }
  0x15   :  { %s2727_s16 = smov [#allocation6]   ;;  %s2698_s20 = scalar_lea.hbm %s3648_s2, 4096 }
  0x16   :  { %s35_s17 = sshll.u32 %s2727_s16, 4  ;;  %p2699_p8 = scmp.ne.s32.totalorder %s3648_s2, %s2698_s20  ;;  %s36_s17 = int_to_ptr.vmem [resolvable:$true] %s35_s17 }
  0x17   :  { %p2702_p9 = scmp.lt.u32.totalorder %s2698_s20, %s3648_s2 }
  0x19   :  { %p2704_p10 = pnand %p2702_p9, %p2699_p8 }
  0x1b   :  { %2707 = shalt.err (!%p2704_p10)
}
  0x1c   :  { %s2708_s25 = scalar_lea.vmem %s36_s17, 4096  ;;  %p2713_p12 = scmp.lt.s32.totalorder %s36_s17, %s36_s17 }
  0x1d   :  { %p2709_p11 = scmp.ne.s32.totalorder %s36_s17, %s2708_s25  ;;  %p2714_p13 = scmp.lt.s32.totalorder %s2708_s25, %s2708_s25 }
  0x1f   :  { %p2715_p0 = por %p2714_p13, %p2713_p12 }
  0x21   :  { %p2716_p1 = pnand %p2715_p0, %p2709_p11 }
  0x23   :  { %2719 = shalt.err (!%p2716_p1)
}
  0x24   :  { %s2728_s1 = smov 256   ;;  %s2729_s26 = smov 16  }
  0x25   :  { %41 = dma.hbm_to_vmem [thread:$0]  %s3648_s2, 4096, %s36_s17, [#allocation7], %s2728_s1, %s2728_s1, %s2729_s26  }
  0x26   :  { %2720 = dma.done.wait [#allocation5], 8192  }
  0x27   :  { %2721 = vsyncadd [#allocation5], 4294959104 }
  0x28   :  { %2722 = dma.done.wait [#allocation7], 4096  }
  0x29   :  { %2723 = vsyncadd [#allocation7], 4294963200  ;;  %v3655_v1 = vmov 0   ;;  %v65_v2 = vld [vmem:[#allocation4] sm:$0xff]  ;;  %v66_v4 = vld [vmem:[#allocation4 + $0x8] sm:$0xff]  ;;  %vm2732_vm15 = vmmov 0  }
  0x2a   :  { %547 = vmatprep.mubr.bf16.mxu0 %v3655_v1  ;;  %620 = vmatprep.mubr.bf16.mxu1 %v3655_v1  ;;  %v69_v3 = vld [vmem:[#allocation4 + $0x20] sm:$0xff]  ;;  %v70_v6 = vld [vmem:[#allocation4 + $0x28] sm:$0xff]  ;;  %v67_v63 = vld [vmem:[#allocation4 + $0x10] sm:$0xff] }
  0x2b   :  { %2457 = vset.pattern.permute.xlu0 %v3655_v1  ;;  %2458 = vset.pattern.permute.xlu1 %v3655_v1  ;;  %v2250_v5 = vcombine.high %v65_v2, %v69_v3  ;;  %v2249_v7 = vcombine.low %v65_v2, %v69_v3  ;;  %v73_v8 = vld [vmem:[#allocation4 + $0x40] sm:$0xff]  ;;  %v2252_v10 = vcombine.high %v66_v4, %v70_v6  ;;  %v74_v13 = vld [vmem:[#allocation4 + $0x48] sm:$0xff]  ;;  %v71_v2 = vld [vmem:[#allocation4 + $0x30] sm:$0xff] }
  0x2c   :  { %v77_v9 = vld [vmem:[#allocation4 + $0x60] sm:$0xff]  ;;  %v2251_v11 = vcombine.low %v66_v4, %v70_v6  ;;  %v78_v14 = vld [vmem:[#allocation4 + $0x68] sm:$0xff]  ;;  %v68_v3 = vld [vmem:[#allocation4 + $0x18] sm:$0xff] }
  0x2d   :  { %v2258_v12 = vcombine.high %v73_v8, %v77_v9  ;;  %v81_v15 = vld [vmem:[#allocation4 + $0x80] sm:$0xff]  ;;  %515 = vmatprep.subr.bf16.mxu0 %v2250_v5  ;;  %v2260_v16 = vcombine.high %v74_v13, %v78_v14  ;;  %v82_v18 = vld [vmem:[#allocation4 + $0x88] sm:$0xff]  ;;  %588 = vmatprep.subr.bf16.mxu1 %v2252_v10  ;;  %v2257_v20 = vcombine.low %v73_v8, %v77_v9  ;;  %v72_v4 = vld [vmem:[#allocation4 + $0x38] sm:$0xff] }
  0x2e   :  { %v85_v17 = vld [vmem:[#allocation4 + $0xa0] sm:$0xff]  ;;  %v86_v19 = vld [vmem:[#allocation4 + $0xa8] sm:$0xff]  ;;  %516 = vmatpush1.bf16.msra.mxu0 %v2249_v7  ;;  %589 = vmatpush1.bf16.msra.mxu1 %v2251_v11  ;;  %v2259_v21 = vcombine.low %v74_v13, %v78_v14  ;;  %v2254_v8 = vcombine.high %v67_v63, %v71_v2  ;;  %v75_v9 = vld [vmem:[#allocation4 + $0x50] sm:$0xff]  ;;  %v2256_v10 = vcombine.high %v68_v3, %v72_v4 }
  0x2f   :  { %517 = vmatprep.subr.bf16.mxu0 %v2258_v12  ;;  %v2266_v22 = vcombine.high %v81_v15, %v85_v17  ;;  %590 = vmatprep.subr.bf16.mxu1 %v2260_v16  ;;  %v2268_v23 = vcombine.high %v82_v18, %v86_v19  ;;  %v89_v24 = vld [vmem:[#allocation4 + $0xc0] sm:$0xff]  ;;  %v90_v26 = vld [vmem:[#allocation4 + $0xc8] sm:$0xff]  ;;  %v2265_v28 = vcombine.low %v81_v15, %v85_v17  ;;  %v79_v11 = vld [vmem:[#allocation4 + $0x70] sm:$0xff] }
  0x30   :  { %v93_v25 = vld [vmem:[#allocation4 + $0xe0] sm:$0xff]  ;;  %v94_v27 = vld [vmem:[#allocation4 + $0xe8] sm:$0xff]  ;;  %v2267_v29 = vcombine.low %v82_v18, %v86_v19  ;;  %v76_v12 = vld [vmem:[#allocation4 + $0x58] sm:$0xff]  ;;  %v2253_v14 = vcombine.low %v67_v63, %v71_v2  ;;  %v2255_v15 = vcombine.low %v68_v3, %v72_v4  ;;  %v2262_v16 = vcombine.high %v75_v9, %v79_v11 }
  0x31   :  { %v2274_v30 = vcombine.high %v89_v24, %v93_v25  ;;  %v2276_v31 = vcombine.high %v90_v26, %v94_v27  ;;  %v97_v32 = vld [vmem:[#allocation4 + $0x100] sm:$0xff]  ;;  %v98_v34 = vld [vmem:[#allocation4 + $0x108] sm:$0xff]  ;;  %v2273_v36 = vcombine.low %v89_v24, %v93_v25  ;;  %v2275_v37 = vcombine.low %v90_v26, %v94_v27  ;;  %v80_v13 = vld [vmem:[#allocation4 + $0x78] sm:$0xff] }
  0x32   :  { %518 = vmatpush1.bf16.msra.mxu0 %v2257_v20  ;;  %591 = vmatpush1.bf16.msra.mxu1 %v2259_v21  ;;  %v101_v33 = vld [vmem:[#allocation4 + $0x120] sm:$0xff]  ;;  %v102_v35 = vld [vmem:[#allocation4 + $0x128] sm:$0xff]  ;;  %v83_v17 = vld [vmem:[#allocation4 + $0x90] sm:$0xff]  ;;  %v2264_v18 = vcombine.high %v76_v12, %v80_v13 }
  0x33   :  { %519 = vmatprep.subr.bf16.mxu0 %v2266_v22  ;;  %592 = vmatprep.subr.bf16.mxu1 %v2268_v23  ;;  %v2282_v38 = vcombine.high %v97_v32, %v101_v33  ;;  %v105_v39 = vld [vmem:[#allocation4 + $0x140] sm:$0xff]  ;;  %v2284_v40 = vcombine.high %v98_v34, %v102_v35  ;;  %v106_v42 = vld [vmem:[#allocation4 + $0x148] sm:$0xff]  ;;  %v2281_v44 = vcombine.low %v97_v32, %v101_v33  ;;  %v87_v19 = vld [vmem:[#allocation4 + $0xb0] sm:$0xff] }
  0x34   :  { %v109_v41 = vld [vmem:[#allocation4 + $0x160] sm:$0xff]  ;;  %v110_v43 = vld [vmem:[#allocation4 + $0x168] sm:$0xff]  ;;  %v2283_v45 = vcombine.low %v98_v34, %v102_v35  ;;  %v84_v20 = vld [vmem:[#allocation4 + $0x98] sm:$0xff]  ;;  %v2261_v22 = vcombine.low %v75_v9, %v79_v11  ;;  %v2263_v23 = vcombine.low %v76_v12, %v80_v13  ;;  %v2270_v25 = vcombine.high %v83_v17, %v87_v19 }
  0x35   :  { %v2290_v46 = vcombine.high %v105_v39, %v109_v41  ;;  %v113_v47 = vld [vmem:[#allocation4 + $0x180] sm:$0xff]  ;;  %v2292_v48 = vcombine.high %v106_v42, %v110_v43  ;;  %v114_v50 = vld [vmem:[#allocation4 + $0x188] sm:$0xff]  ;;  %v2289_v52 = vcombine.low %v105_v39, %v109_v41  ;;  %v2291_v53 = vcombine.low %v106_v42, %v110_v43  ;;  %v88_v21 = vld [vmem:[#allocation4 + $0xb8] sm:$0xff] }
  0x36   :  { %520 = vmatpush1.bf16.msra.mxu0 %v2265_v28  ;;  %593 = vmatpush1.bf16.msra.mxu1 %v2267_v29  ;;  %v117_v49 = vld [vmem:[#allocation4 + $0x1a0] sm:$0xff]  ;;  %v118_v51 = vld [vmem:[#allocation4 + $0x1a8] sm:$0xff]  ;;  %v91_v26 = vld [vmem:[#allocation4 + $0xd0] sm:$0xff]  ;;  %v2272_v27 = vcombine.high %v84_v20, %v88_v21  ;;  %v2271_v32 = vcombine.low %v84_v20, %v88_v21 }
  0x37   :  { %521 = vmatprep.subr.bf16.mxu0 %v2274_v30  ;;  %594 = vmatprep.subr.bf16.mxu1 %v2276_v31  ;;  %v2298_v54 = vcombine.high %v113_v47, %v117_v49  ;;  %v2300_v55 = vcombine.high %v114_v50, %v118_v51  ;;  %v121_v56 = vld [vmem:[#allocation4 + $0x1c0] sm:$0xff]  ;;  %v122_v58 = vld [vmem:[#allocation4 + $0x1c8] sm:$0xff]  ;;  %v2297_v60 = vcombine.low %v113_v47, %v117_v49  ;;  %v95_v28 = vld [vmem:[#allocation4 + $0xf0] sm:$0xff] }
  0x38   :  { %v125_v57 = vld [vmem:[#allocation4 + $0x1e0] sm:$0xff]  ;;  %v126_v59 = vld [vmem:[#allocation4 + $0x1e8] sm:$0xff]  ;;  %v2299_v61 = vcombine.low %v114_v50, %v118_v51  ;;  %v92_v29 = vld [vmem:[#allocation4 + $0xd8] sm:$0xff]  ;;  %v2269_v31 = vcombine.low %v83_v17, %v87_v19  ;;  %v2278_v33 = vcombine.high %v91_v26, %v95_v28  ;;  %v2277_v39 = vcombine.low %v91_v26, %v95_v28 }
  0x39   :  { %v2306_v62 = vcombine.high %v121_v56, %v125_v57  ;;  %v2308_v0 = vcombine.high %v122_v58, %v126_v59  ;;  %v2305_v5 = vcombine.low %v121_v56, %v125_v57  ;;  %v2307_v6 = vcombine.low %v122_v58, %v126_v59  ;;  %v2808_v7 = vld [vmem:[%s3646_s0] sm:$0xff]   ;;  %v2815_v24 = vld [vmem:[%s3646_s0 + $0x8] sm:$0xff]   ;;  %v99_v34 = vld [vmem:[#allocation4 + $0x110] sm:$0xff] }
  0x3a   :  { %522 = vmatpush1.bf16.msra.mxu0 %v2273_v36  ;;  %595 = vmatpush1.bf16.msra.mxu1 %v2275_v37  ;;  %v96_v30 = vld [vmem:[#allocation4 + $0xf8] sm:$0xff]  ;;  %v103_v36 = vld [vmem:[#allocation4 + $0x130] sm:$0xff] }
  0x3b   :  { %523 = vmatprep.subr.bf16.mxu0 %v2282_v38  ;;  %596 = vmatprep.subr.bf16.mxu1 %v2284_v40  ;;  %v2280_v35 = vcombine.high %v92_v29, %v96_v30  ;;  %v100_v37 = vld [vmem:[#allocation4 + $0x118] sm:$0xff]  ;;  %v2279_v40 = vcombine.low %v92_v29, %v96_v30  ;;  %v2286_v41 = vcombine.high %v99_v34, %v103_v36  ;;  %v107_v43 = vld [vmem:[#allocation4 + $0x150] sm:$0xff] }
  0x3c   :  { %v104_v38 = vld [vmem:[#allocation4 + $0x138] sm:$0xff]  ;;  %v2285_v49 = vcombine.low %v99_v34, %v103_v36  ;;  %v127_v63 = vld [vmem:[#allocation4 + $0x1f0] sm:$0xff] }
  0x3d   :  { %v2288_v42 = vcombine.high %v100_v37, %v104_v38  ;;  %v108_v47 = vld [vmem:[#allocation4 + $0x158] sm:$0xff]  ;;  %v2287_v51 = vcombine.low %v100_v37, %v104_v38  ;;  %v2846_v11 = vld [vmem:[#allocation6 + $0x4] ss:$16 sps:$4 sm:$0xff]   ;;  %v2852_v13 = vld [vmem:[#allocation6] ss:$16 sps:$4 sm:$0xff]  }
  0x3e   :  { %524 = vmatpush1.bf16.msra.mxu0 %v2281_v44  ;;  %597 = vmatpush1.bf16.msra.mxu1 %v2283_v45  ;;  %v111_v44 = vld [vmem:[#allocation4 + $0x170] sm:$0xff]  ;;  %v2825_v45 = vld [vmem:[%s3652_s6] sm:$0xff]  ;;  %3711 = vst [vmem:[#allocation11_spill] sm:$0xff] %v2846_v11  ;;  %v2883_v21 = vld [vmem:[#allocation6 + $0x48] ss:$16 sps:$4 sm:$0xff]  }
  0x3f   :  { %525 = vmatprep.subr.bf16.mxu0 %v2290_v46  ;;  %598 = vmatprep.subr.bf16.mxu1 %v2292_v48  ;;  %3710 = vst [vmem:[#allocation10_spill] sm:$0xff] %v2825_v45  ;;  %v2831_v46 = vld [vmem:[%s3646_s0 + $0x10] sm:$0xff]   ;;  %v112_v48 = vld [vmem:[#allocation4 + $0x178] sm:$0xff]  ;;  %vm1192_vm0 = vcmp.eq.s32.totalorder %v2825_v45, 1  ;;  %v2293_v58 = vcombine.low %v107_v43, %v111_v44  ;;  %3716 = vst [vmem:[#allocation16_spill] sm:$0xff] %v2883_v21  ;;  %vm1328_vm1 = vcmp.eq.s32.totalorder %v2825_v45, 2 }
  0x40   :  { %v1193_v50 = vsel %vm1192_vm0, 1, %v3655_v1  ;;  %v116_v56 = vld [vmem:[#allocation4 + $0x198] sm:$0xff]  ;;  %v2295_v59 = vcombine.low %v108_v47, %v112_v48  ;;  %v2865_v17 = vld [vmem:[#allocation6 + $0x20] ss:$16 sps:$4 sm:$0xff]   ;;  %v2871_v19 = vld [vmem:[#allocation6 + $0x44] ss:$16 sps:$4 sm:$0xff]  }
  0x41   :  { %1195 = vperm.xlu0 %2457, %v1193_v50   ;;  %v120_v57 = vld [vmem:[#allocation4 + $0x1b8] sm:$0xff]  ;;  %3713 = vst [vmem:[#allocation13_spill] sm:$0xff] %v2871_v19  ;;  %v2913_v30 = vld [vmem:[#allocation6 + $0xa4] ss:$16 sps:$4 sm:$0xff]   ;;  %v2935_v36 = vld [vmem:[#allocation6 + $0xc0] ss:$16 sps:$4 sm:$0xff]  }
  0x42   :  { %526 = vmatpush1.bf16.msra.mxu0 %v2289_v52  ;;  %599 = vmatpush1.bf16.msra.mxu1 %v2291_v53  ;;  %v2294_v52 = vcombine.high %v107_v43, %v111_v44  ;;  %v2296_v53 = vcombine.high %v108_v47, %v112_v48  ;;  %v124_v2 = vld [vmem:[#allocation4 + $0x1d8] sm:$0xff]  ;;  %3725 = vst [vmem:[#allocation25_spill] sm:$0xff] %v2913_v30  ;;  %v2927_v34 = vld [vmem:[#allocation6 + $0xc4] ss:$16 sps:$4 sm:$0xff]   ;;  %3731 = vst [vmem:[#allocation31_spill] sm:$0xff] %v2935_v36  ;;  %v3654_v43 = vlaneseq }
  0x43   :  { %527 = vmatprep.subr.bf16.mxu0 %v2298_v54  ;;  %600 = vmatprep.subr.bf16.mxu1 %v2300_v55  ;;  %v115_v54 = vld [vmem:[#allocation4 + $0x190] sm:$0xff]  ;;  %v128_v3 = vld [vmem:[#allocation4 + $0x1f8] sm:$0xff]  ;;  %3729 = vst [vmem:[#allocation29_spill] sm:$0xff] %v2927_v34 }
  0x44   :  { %v119_v55 = vld [vmem:[#allocation4 + $0x1b0] sm:$0xff]  ;;  %v2849_v12 = vld [vmem:[#allocation6 + $0xc] ss:$16 sps:$4 sm:$0xff]   ;;  %v2897_v26 = vld [vmem:[#allocation6 + $0x68] ss:$16 sps:$4 sm:$0xff]   ;;  %v3001_v44 = vshrl.u32 %v3654_v43, 7 }
  0x45   :  { %v2301_v4 = vcombine.low %v115_v54, %v119_v55  ;;  %3712 = vst [vmem:[#allocation12_spill] sm:$0xff] %v2849_v12  ;;  %v2875_v20 = vld [vmem:[#allocation6 + $0x4c] ss:$16 sps:$4 sm:$0xff]   ;;  %3720 = vst [vmem:[#allocation20_spill] sm:$0xff] %v2897_v26  ;;  %v2911_v29 = vld [vmem:[#allocation6 + $0x88] ss:$16 sps:$4 sm:$0xff]  }
  0x46   :  { %528 = vmatpush1.bf16.msra.mxu0 %v2297_v60  ;;  %601 = vmatpush1.bf16.msra.mxu1 %v2299_v61  ;;  %v2302_v60 = vcombine.high %v115_v54, %v119_v55  ;;  %v2304_v61 = vcombine.high %v116_v56, %v120_v57  ;;  %3714 = vst [vmem:[#allocation14_spill] sm:$0xff] %v2875_v20  ;;  %v2903_v28 = vld [vmem:[#allocation6 + $0x8c] ss:$16 sps:$4 sm:$0xff]   ;;  %3724 = vst [vmem:[#allocation24_spill] sm:$0xff] %v2911_v29  ;;  %v2939_v37 = vld [vmem:[#allocation6 + $0xc8] ss:$16 sps:$4 sm:$0xff]  }
  0x47   :  { %529 = vmatprep.subr.bf16.mxu0 %v2306_v62  ;;  %602 = vmatprep.subr.bf16.mxu1 %v2308_v0  ;;  %v123_v62 = vld [vmem:[#allocation4 + $0x1d0] sm:$0xff]  ;;  %3722 = vst [vmem:[#allocation22_spill] sm:$0xff] %v2903_v28  ;;  %3732 = vst [vmem:[#allocation32_spill] sm:$0xff] %v2939_v37  ;;  %v133_v47 = vsub.s32 0, %v3001_v44  ;;  %v145_v48 = vsub.s32 3, %v3001_v44  ;;  %v137_v50 = vsub.s32 1, %v3001_v44 }
  0x48   :  { %v2842_v0 = vld [vmem:[%s3646_s0 + $0x18] sm:$0xff]   ;;  %v2309_v9 = vcombine.low %v123_v62, %v127_v63 }
  0x49   :  { %v2941_v38 = vld [vmem:[#allocation6 + $0xe4] ss:$16 sps:$4 sm:$0xff]  }
  0x4a   :  { %530 = vmatpush1.bf16.msra.mxu0 %v2305_v5  ;;  %603 = vmatpush1.bf16.msra.mxu1 %v2307_v6  ;;  %v2303_v5 = vcombine.low %v116_v56, %v120_v57  ;;  %v2310_v6 = vcombine.high %v123_v62, %v127_v63  ;;  %3733 = vst [vmem:[#allocation33_spill] sm:$0xff] %v2941_v38 }
  0x4b   :  { %661 = vmatprep.subr.bf16.mxu0 %v2254_v8  ;;  %734 = vmatprep.subr.bf16.mxu1 %v2256_v10  ;;  %v2312_v8 = vcombine.high %v124_v2, %v128_v3  ;;  %v2311_v10 = vcombine.low %v124_v2, %v128_v3 }
  0x4d   :  { %548 = vmatmul.mubr.bf16.vlgmr.msra.gmra.mrb[0].mxu0 %v2808_v7  ;;  %621 = vmatmul.mubr.bf16.vlgmr.msra.gmra.mrb[0].mxu1 %v2808_v7 }
  0x4e   :  { %662 = vmatpush1.bf16.msra.mxu0 %v2253_v14  ;;  %735 = vmatpush1.bf16.msra.mxu1 %v2255_v15  ;;  %v2855_v14 = vld [vmem:[#allocation6 + $0x8] ss:$16 sps:$4 sm:$0xff]   ;;  %v2857_v15 = vld [vmem:[#allocation6 + $0x24] ss:$16 sps:$4 sm:$0xff]  }
  0x4f   :  { %663 = vmatprep.subr.bf16.mxu0 %v2262_v16  ;;  %736 = vmatprep.subr.bf16.mxu1 %v2264_v18  ;;  %v2860_v16 = vld [vmem:[#allocation6 + $0x2c] ss:$16 sps:$4 sm:$0xff]   ;;  %v2869_v18 = vld [vmem:[#allocation6 + $0x28] ss:$16 sps:$4 sm:$0xff]  }
  0x50   :  { %557 = vmatprep.mubr.bf16.mxu0 %v3655_v1  ;;  %630 = vmatprep.mubr.bf16.mxu1 %v3655_v1 }
  0x52   :  { %664 = vmatpush1.bf16.msra.mxu0 %v2261_v22  ;;  %737 = vmatpush1.bf16.msra.mxu1 %v2263_v23  ;;  %v2885_v22 = vld [vmem:[#allocation6 + $0x64] ss:$16 sps:$4 sm:$0xff]   ;;  %v2888_v23 = vld [vmem:[#allocation6 + $0x6c] ss:$16 sps:$4 sm:$0xff]  }
  0x53   :  { %665 = vmatprep.subr.bf16.mxu0 %v2270_v25  ;;  %738 = vmatprep.subr.bf16.mxu1 %v2272_v27  ;;  %3717 = vst [vmem:[#allocation17_spill] sm:$0xff] %v2885_v22  ;;  %3718 = vst [vmem:[#allocation18_spill] sm:$0xff] %v2888_v23  ;;  %v2893_v25 = vld [vmem:[#allocation6 + $0x60] ss:$16 sps:$4 sm:$0xff]   ;;  %v2899_v27 = vld [vmem:[#allocation6 + $0x84] ss:$16 sps:$4 sm:$0xff]  }
  0x54   :  { %3719 = vst [vmem:[#allocation19_spill] sm:$0xff] %v2893_v25  ;;  %3721 = vst [vmem:[#allocation21_spill] sm:$0xff] %v2899_v27 }
  0x55   :  { %558 = vmatmul.mubr.bf16.gmra.mrb[4].mxu0 %v2815_v24  ;;  %631 = vmatmul.mubr.bf16.gmra.mrb[4].mxu1 %v2815_v24 }
  0x56   :  { %666 = vmatpush1.bf16.msra.mxu0 %v2269_v31  ;;  %739 = vmatpush1.bf16.msra.mxu1 %v2271_v32  ;;  %v2916_v31 = vld [vmem:[#allocation6 + $0xac] ss:$16 sps:$4 sm:$0xff]   ;;  %v2921_v32 = vld [vmem:[#allocation6 + $0xa0] ss:$16 sps:$4 sm:$0xff]  }
  0x57   :  { %667 = vmatprep.subr.bf16.mxu0 %v2278_v33  ;;  %740 = vmatprep.subr.bf16.mxu1 %v2280_v35  ;;  %3726 = vst [vmem:[#allocation26_spill] sm:$0xff] %v2916_v31  ;;  %3727 = vst [vmem:[#allocation27_spill] sm:$0xff] %v2921_v32  ;;  %v2925_v33 = vld [vmem:[#allocation6 + $0xa8] ss:$16 sps:$4 sm:$0xff]   ;;  %v2931_v35 = vld [vmem:[#allocation6 + $0xcc] ss:$16 sps:$4 sm:$0xff]  }
  0x58   :  { %567 = vmatprep.mubr.bf16.mxu0 %v3655_v1  ;;  %640 = vmatprep.mubr.bf16.mxu1 %v3655_v1  ;;  %3728 = vst [vmem:[#allocation28_spill] sm:$0xff] %v2925_v33  ;;  %3730 = vst [vmem:[#allocation30_spill] sm:$0xff] %v2931_v35 }
  0x5a   :  { %668 = vmatpush1.bf16.msra.mxu0 %v2277_v39  ;;  %741 = vmatpush1.bf16.msra.mxu1 %v2279_v40  ;;  %v2944_v39 = vld [vmem:[#allocation6 + $0xec] ss:$16 sps:$4 sm:$0xff]   ;;  %v2949_v40 = vld [vmem:[#allocation6 + $0xe0] ss:$16 sps:$4 sm:$0xff]  }
  0x5b   :  { %669 = vmatprep.subr.bf16.mxu0 %v2286_v41  ;;  %742 = vmatprep.subr.bf16.mxu1 %v2288_v42  ;;  %3734 = vst [vmem:[#allocation34_spill] sm:$0xff] %v2944_v39  ;;  %3735 = vst [vmem:[#allocation35_spill] sm:$0xff] %v2949_v40  ;;  %v2953_v41 = vld [vmem:[#allocation6 + $0xe8] ss:$16 sps:$4 sm:$0xff]   ;;  %v1329_v42 = vsel %vm1328_vm1, 1, %v3655_v1 }
  0x5c   :  { %3736 = vst [vmem:[#allocation36_spill] sm:$0xff] %v2953_v41  ;;  %1331 = vperm.xlu0 %2457, %v1329_v42  }
  0x5d   :  { %568 = vmatmul.mubr.bf16.gmra.mrb[8].mxu0 %v2831_v46  ;;  %641 = vmatmul.mubr.bf16.gmra.mrb[8].mxu1 %v2831_v46 }
  0x5e   :  { %670 = vmatpush1.bf16.msra.mxu0 %v2285_v49  ;;  %743 = vmatpush1.bf16.msra.mxu1 %v2287_v51  ;;  %v3009_v49 = vld [vmem:[%s3649_s3] sm:$0xff] }
  0x5f   :  { %671 = vmatprep.subr.bf16.mxu0 %v2294_v52  ;;  %744 = vmatprep.subr.bf16.mxu1 %v2296_v53  ;;  %v3018_v53 = vrot.slane %v3009_v49, %v133_v47  ;;  %v3025_v56 = vrot.slane %v3009_v49, %v145_v48  ;;  %v3028_v57 = vrot.slane %v3009_v49, %v137_v50 }
  0x60   :  { %577 = vmatprep.mubr.bf16.mxu0 %v3655_v1  ;;  %650 = vmatprep.mubr.bf16.mxu1 %v3655_v1 }
  0x62   :  { %672 = vmatpush1.bf16.msra.mxu0 %v2293_v58  ;;  %745 = vmatpush1.bf16.msra.mxu1 %v2295_v59 }
  0x63   :  { %673 = vmatprep.subr.bf16.mxu0 %v2302_v60  ;;  %746 = vmatprep.subr.bf16.mxu1 %v2304_v61 }
  0x65   :  { %578 = vmatmul.mubr.bf16.gmra.mrb[12].mxu0 %v2842_v0  ;;  %651 = vmatmul.mubr.bf16.gmra.mrb[12].mxu1 %v2842_v0 }
  0x66   :  { %674 = vmatpush1.bf16.msra.mxu0 %v2301_v4  ;;  %747 = vmatpush1.bf16.msra.mxu1 %v2303_v5 }
  0x67   :  { %675 = vmatprep.subr.bf16.mxu0 %v2310_v6  ;;  %748 = vmatprep.subr.bf16.mxu1 %v2312_v8 }
  0x68   :  { %693 = vmatprep.mubr.bf16.mxu0 %v3655_v1  ;;  %766 = vmatprep.mubr.bf16.mxu1 %v3655_v1 }
  0x6a   :  { %676 = vmatpush1.bf16.msra.mxu0 %v2309_v9  ;;  %749 = vmatpush1.bf16.msra.mxu1 %v2311_v10 }
  0x6b   :  { %1082 = vmatprep.subr.bf16.mxu0 %v2846_v11  ;;  %1123 = vmatprep.subr.bf16.mxu1 %v2849_v12 }
  0x6d   :  { %694 = vmatmul.mubr.bf16.vlgmr.msra.gmra.mrb[16].mxu0 %v2808_v7  ;;  %767 = vmatmul.mubr.bf16.vlgmr.msra.gmra.mrb[16].mxu1 %v2808_v7  ;;  %v2879_v7 = vld [vmem:[#allocation6 + $0x40] ss:$16 sps:$4 sm:$0xff]  }
  0x6e   :  { %1083 = vmatpush1.bf16.msra.mxu0 %v2852_v13  ;;  %1124 = vmatpush1.bf16.msra.mxu1 %v2855_v14  ;;  %3715 = vst [vmem:[#allocation15_spill] sm:$0xff] %v2879_v7 }
  0x6f   :  { %1084 = vmatprep.subr.bf16.mxu0 %v2857_v15  ;;  %1125 = vmatprep.subr.bf16.mxu1 %v2860_v16 }
  0x70   :  { %703 = vmatprep.mubr.bf16.mxu0 %v3655_v1  ;;  %776 = vmatprep.mubr.bf16.mxu1 %v3655_v1 }
  0x72   :  { %1085 = vmatpush1.bf16.msra.mxu0 %v2865_v17  ;;  %1126 = vmatpush1.bf16.msra.mxu1 %v2869_v18 }
  0x73   :  { %1086 = vmatprep.subr.bf16.mxu0 %v2871_v19  ;;  %1127 = vmatprep.subr.bf16.mxu1 %v2875_v20 }
  0x75   :  { %704 = vmatmul.mubr.bf16.gmra.mrb[20].mxu0 %v2815_v24  ;;  %777 = vmatmul.mubr.bf16.gmra.mrb[20].mxu1 %v2815_v24  ;;  %v2907_v24 = vld [vmem:[#allocation6 + $0x80] ss:$16 sps:$4 sm:$0xff]  }
  0x76   :  { %1087 = vmatpush1.bf16.msra.mxu0 %v2879_v7  ;;  %1128 = vmatpush1.bf16.msra.mxu1 %v2883_v21  ;;  %3723 = vst [vmem:[#allocation23_spill] sm:$0xff] %v2907_v24 }
  0x77   :  { %1088 = vmatprep.subr.bf16.mxu0 %v2885_v22  ;;  %1129 = vmatprep.subr.bf16.mxu1 %v2888_v23 }
  0x78   :  { %713 = vmatprep.mubr.bf16.mxu0 %v3655_v1  ;;  %786 = vmatprep.mubr.bf16.mxu1 %v3655_v1 }
  0x7a   :  { %1089 = vmatpush1.bf16.msra.mxu0 %v2893_v25  ;;  %1130 = vmatpush1.bf16.msra.mxu1 %v2897_v26 }
  0x7b   :  { %1090 = vmatprep.subr.bf16.mxu0 %v2899_v27  ;;  %1131 = vmatprep.subr.bf16.mxu1 %v2903_v28 }
  0x7d   :  { %714 = vmatmul.mubr.bf16.gmra.mrb[24].mxu0 %v2831_v46  ;;  %787 = vmatmul.mubr.bf16.gmra.mrb[24].mxu1 %v2831_v46  ;;  %v141_v46 = vsub.s32 2, %v3001_v44 }
  0x7e   :  { %1091 = vmatpush1.bf16.msra.mxu0 %v2907_v24  ;;  %1132 = vmatpush1.bf16.msra.mxu1 %v2911_v29 }
  0x7f   :  { %1092 = vmatprep.subr.bf16.mxu0 %v2913_v30  ;;  %1133 = vmatprep.subr.bf16.mxu1 %v2916_v31  ;;  %v3015_v52 = vrot.slane %v3009_v49, %v141_v46 }
  0x80   :  { %723 = vmatprep.mubr.bf16.mxu0 %v3655_v1  ;;  %796 = vmatprep.mubr.bf16.mxu1 %v3655_v1 }
  0x82   :  { %1093 = vmatpush1.bf16.msra.mxu0 %v2921_v32  ;;  %1134 = vmatpush1.bf16.msra.mxu1 %v2925_v33 }
  0x83   :  { %1094 = vmatprep.subr.bf16.mxu0 %v2927_v34  ;;  %1135 = vmatprep.subr.bf16.mxu1 %v2931_v35 }
  0x85   :  { %724 = vmatmul.mubr.bf16.gmra.mrb[28].mxu0 %v2842_v0  ;;  %797 = vmatmul.mubr.bf16.gmra.mrb[28].mxu1 %v2842_v0 }
  0x86   :  { %1095 = vmatpush1.bf16.msra.mxu0 %v2935_v36  ;;  %1136 = vmatpush1.bf16.msra.mxu1 %v2939_v37 }
  0x87   :  { %1096 = vmatprep.subr.bf16.mxu0 %v2941_v38  ;;  %1137 = vmatprep.subr.bf16.mxu1 %v2944_v39 }
  0x88   :  { %1114 = vmatprep.mubr.bf16.mxu0 %v3655_v1  ;;  %1155 = vmatprep.mubr.bf16.mxu1 %v3655_v1 }
  0x8a   :  { %1097 = vmatpush1.bf16.msra.mxu0 %v2949_v40  ;;  %1138 = vmatpush1.bf16.msra.mxu1 %v2953_v41 }
  0x8b   :  { %1218 = vmatprep.subr.bf16.mxu0 %v2846_v11  ;;  %1259 = vmatprep.subr.bf16.mxu1 %v2849_v12 }
  0x8d   :  { %1115 = vmatmul.mubr.bf16.vlgmr.msra.gmra.mrb[32].mxu0 %v3655_v1  ;;  %1156 = vmatmul.mubr.bf16.vlgmr.msra.gmra.mrb[32].mxu1 %v3655_v1 }
  0x8e   :  { %1219 = vmatpush1.bf16.msra.mxu0 %v2852_v13  ;;  %1260 = vmatpush1.bf16.msra.mxu1 %v2855_v14 }
  0x8f   :  { %1220 = vmatprep.subr.bf16.mxu0 %v2857_v15  ;;  %1261 = vmatprep.subr.bf16.mxu1 %v2860_v16 }
  0x90   :  { %1250 = vmatprep.mubr.bf16.mxu0 %v3655_v1  ;;  %1291 = vmatprep.mubr.bf16.mxu1 %v3655_v1 }
  0x92   :  { %1221 = vmatpush1.bf16.msra.mxu0 %v2865_v17  ;;  %1262 = vmatpush1.bf16.msra.mxu1 %v2869_v18 }
  0x93   :  { %1222 = vmatprep.subr.bf16.mxu0 %v2871_v19  ;;  %1263 = vmatprep.subr.bf16.mxu1 %v2875_v20 }
  0x96   :  { %1223 = vmatpush1.bf16.msra.mxu0 %v2879_v7  ;;  %1264 = vmatpush1.bf16.msra.mxu1 %v2883_v21 }
  0x97   :  { %1224 = vmatprep.subr.bf16.mxu0 %v2885_v22  ;;  %1265 = vmatprep.subr.bf16.mxu1 %v2888_v23 }
  0x9a   :  { %1225 = vmatpush1.bf16.msra.mxu0 %v2893_v25  ;;  %1266 = vmatpush1.bf16.msra.mxu1 %v2897_v26 }
  0x9b   :  { %1226 = vmatprep.subr.bf16.mxu0 %v2899_v27  ;;  %1267 = vmatprep.subr.bf16.mxu1 %v2903_v28 }
  0x9e   :  { %1227 = vmatpush1.bf16.msra.mxu0 %v2907_v24  ;;  %1268 = vmatpush1.bf16.msra.mxu1 %v2911_v29 }
  0x9f   :  { %1228 = vmatprep.subr.bf16.mxu0 %v2913_v30  ;;  %1269 = vmatprep.subr.bf16.mxu1 %v2916_v31  ;;  %v161_v31 = vsub.s32 7, %v3001_v44 }
  0xa2   :  { %1229 = vmatpush1.bf16.msra.mxu0 %v2921_v32  ;;  %1270 = vmatpush1.bf16.msra.mxu1 %v2925_v33 }
  0xa3   :  { %1230 = vmatprep.subr.bf16.mxu0 %v2927_v34  ;;  %1271 = vmatprep.subr.bf16.mxu1 %v2931_v35  ;;  %v157_v34 = vsub.s32 6, %v3001_v44 }
  0xa6   :  { %1231 = vmatpush1.bf16.msra.mxu0 %v2935_v36  ;;  %1272 = vmatpush1.bf16.msra.mxu1 %v2939_v37  ;;  %v149_v37 = vsub.s32 4, %v3001_v44 }
  0xa7   :  { %1232 = vmatprep.subr.bf16.mxu0 %v2941_v38  ;;  %1273 = vmatprep.subr.bf16.mxu1 %v2944_v39 }
  0xaa   :  { %1233 = vmatpush1.bf16.msra.mxu0 %v2949_v40  ;;  %1274 = vmatpush1.bf16.msra.mxu1 %v2953_v41 }
  0xab   :  { %1354 = vmatprep.subr.bf16.mxu0 %v2846_v11  ;;  %1395 = vmatprep.subr.bf16.mxu1 %v2849_v12 }
 0x120   :  { %v3012_v51 = vpop.f32.mrb[0].mxu0  ;;  %v3022_v55 = vpop.f32.mrb[0].mxu1 }
 0x121   :  { %v3020_v54 = vpop.f32.mrb[1].mxu0  ;;  %v3030_v59 = vpop.f32.mrb[1].mxu1 }
 0x122   :  { %v553_v58 = vpop.f32.mrb[2].mxu0  ;;  %v626_v62 = vpop.f32.mrb[2].mxu1 }
 0x123   :  { %v3033_v60 = vadd.f32 %v553_v58, %v3018_v53  ;;  %v555_v61 = vpop.f32.mrb[3].mxu0  ;;  %v3039_v0 = vadd.f32 %v626_v62, %v3015_v52  ;;  %v628_v2 = vpop.f32.mrb[3].mxu1 }
 0x124   :  { %v3036_v63 = vadd.f32 %v555_v61, %v3028_v57  ;;  %v3042_v3 = vadd.f32 %v628_v2, %v3025_v56 }
 0x128   :  { %v559_v4 = vpop.f32.mrb[4].mxu0  ;;  %v632_v8 = vpop.f32.mrb[4].mxu1 }
 0x129   :  { %v3045_v5 = vadd.f32 %v559_v4, %v3018_v53  ;;  %v561_v6 = vpop.f32.mrb[5].mxu0  ;;  %v3051_v42 = vadd.f32 %v632_v8, %v3015_v52  ;;  %v634_v46 = vpop.f32.mrb[5].mxu1 }
 0x12a   :  { %v3048_v9 = vadd.f32 %v561_v6, %v3028_v57  ;;  %v563_v10 = vpop.f32.mrb[6].mxu0  ;;  %v3057_v50 = vadd.f32 %v634_v46, %v3025_v56  ;;  %v636_v58 = vpop.f32.mrb[6].mxu1 }
 0x12b   :  { %v3054_v47 = vadd.f32 %v563_v10, %v3018_v53  ;;  %v565_v48 = vpop.f32.mrb[7].mxu0  ;;  %v3063_v62 = vadd.f32 %v636_v58, %v3015_v52  ;;  %v638_v2 = vpop.f32.mrb[7].mxu1 }
 0x12c   :  { %v3060_v61 = vadd.f32 %v565_v48, %v3028_v57  ;;  %v3066_v4 = vadd.f32 %v638_v2, %v3025_v56 }
 0x130   :  { %v569_v6 = vpop.f32.mrb[8].mxu0  ;;  %v642_v43 = vpop.f32.mrb[8].mxu1 }
 0x131   :  { %v3069_v8 = vadd.f32 %v569_v6, %v3018_v53  ;;  %v571_v10 = vpop.f32.mrb[9].mxu0  ;;  %v3075_v48 = vadd.f32 %v642_v43, %v3015_v52  ;;  %v644_v45 = vpop.f32.mrb[9].mxu1 }
 0x132   :  { %v3072_v46 = vadd.f32 %v571_v10, %v3028_v57  ;;  %v573_v1 = vpop.f32.mrb[10].mxu0  ;;  %v3081_v2 = vadd.f32 %v644_v45, %v3025_v56  ;;  %v646_v11 = vpop.f32.mrb[10].mxu1 }
 0x133   :  { %v3078_v58 = vadd.f32 %v573_v1, %v3018_v53  ;;  %v575_v12 = vpop.f32.mrb[11].mxu0  ;;  %v3087_v41 = vadd.f32 %v646_v11, %v3015_v52  ;;  %v648_v10 = vpop.f32.mrb[11].mxu1  ;;  %v153_v11 = vsub.s32 5, %v3001_v44 }
 0x134   :  { %v3084_v6 = vadd.f32 %v575_v12, %v3028_v57  ;;  %v3090_v40 = vadd.f32 %v648_v10, %v3025_v56 }
 0x135   :  { %v3108_v28 = vrot.slane %v3009_v49, %v153_v11 }
 0x138   :  { %v579_v43 = vpop.f32.mrb[12].mxu0  ;;  %v652_v38 = vpop.f32.mrb[12].mxu1 }
 0x139   :  { %v580_v39 = vadd.f32 %v579_v43, %v3018_v53  ;;  %v581_v1 = vpop.f32.mrb[13].mxu0  ;;  %v653_v12 = vadd.f32 %v652_v38, %v3015_v52  ;;  %v654_v35 = vpop.f32.mrb[13].mxu1  ;;  %v3104_v38 = vrot.slane %v3009_v49, %v149_v37 }
 0x13a   :  { %v582_v45 = vadd.f32 %v581_v1, %v3028_v57  ;;  %v583_v36 = vpop.f32.mrb[14].mxu0  ;;  %v655_v32 = vadd.f32 %v654_v35, %v3025_v56  ;;  %v656_v43 = vpop.f32.mrb[14].mxu1  ;;  %v3114_v35 = vrot.slane %v3009_v49, %v161_v31 }
 0x13b   :  { %v584_v10 = vadd.f32 %v583_v36, %v3018_v53  ;;  %v585_v33 = vpop.f32.mrb[15].mxu0  ;;  %v657_v1 = vadd.f32 %v656_v43, %v3015_v52  ;;  %v658_v29 = vpop.f32.mrb[15].mxu1  ;;  %v3111_v36 = vrot.slane %v3009_v49, %v157_v34 }
 0x13c   :  { %v586_v30 = vadd.f32 %v585_v33, %v3028_v57  ;;  %v659_v24 = vadd.f32 %v658_v29, %v3025_v56 }
 0x140   :  { %v695_v44 = vpop.f32.mrb[16].mxu0  ;;  %v768_v43 = vpop.f32.mrb[16].mxu1 }
 0x141   :  { %v696_v33 = vadd.f32 %v695_v44, %v3104_v38  ;;  %v697_v27 = vpop.f32.mrb[17].mxu0  ;;  %v769_v25 = vadd.f32 %v768_v43, %v3111_v36  ;;  %v770_v29 = vpop.f32.mrb[17].mxu1 }
 0x142   :  { %v698_v26 = vadd.f32 %v697_v27, %v3108_v28  ;;  %v699_v37 = vpop.f32.mrb[18].mxu0  ;;  %v771_v34 = vadd.f32 %v770_v29, %v3114_v35  ;;  %v772_v22 = vpop.f32.mrb[18].mxu1 }
 0x143   :  { %v700_v11 = vadd.f32 %v699_v37, %v3104_v38  ;;  %v701_v23 = vpop.f32.mrb[19].mxu0  ;;  %v3121_v21 = vadd.f32 %v696_v33, %v584_v10  ;;  %v773_v49 = vadd.f32 %v772_v22, %v3111_v36  ;;  %v774_v44 = vpop.f32.mrb[19].mxu1  ;;  %v3125_v7 = vadd.f32 %v769_v25, %v657_v1 }
 0x144   :  { %v702_v31 = vadd.f32 %v701_v23, %v3108_v28  ;;  %v3127_v27 = vadd.f32 %v698_v26, %v586_v30  ;;  %v775_v43 = vadd.f32 %v774_v44, %v3114_v35  ;;  %v3132_v37 = vadd.f32 %v771_v34, %v659_v24 }
 0x145   :  { %3737 = vst [vmem:[#allocation37_spill] sm:$0xff] %v3121_v21  ;;  %3738 = vst [vmem:[#allocation38_spill] sm:$0xff] %v3125_v7  ;;  %v3130_v20 = vadd.f32 %v700_v11, %v580_v39  ;;  %v3134_v19 = vadd.f32 %v773_v49, %v653_v12 }
 0x146   :  { %3739 = vst [vmem:[#allocation39_spill] sm:$0xff] %v3127_v27  ;;  %3741 = vst [vmem:[#allocation41_spill] sm:$0xff] %v3132_v37  ;;  %v3136_v29 = vadd.f32 %v702_v31, %v582_v45  ;;  %v3138_v10 = vadd.f32 %v775_v43, %v655_v32 }
 0x147   :  { %3740 = vst [vmem:[#allocation40_spill] sm:$0xff] %v3130_v20  ;;  %3742 = vst [vmem:[#allocation42_spill] sm:$0xff] %v3134_v19 }
 0x148   :  { %3743 = vst [vmem:[#allocation43_spill] sm:$0xff] %v3136_v29  ;;  %3744 = vst [vmem:[#allocation44_spill] sm:$0xff] %v3138_v10  ;;  %v705_v23 = vpop.f32.mrb[20].mxu0  ;;  %v778_v33 = vpop.f32.mrb[20].mxu1 }
 0x149   :  { %v706_v22 = vadd.f32 %v705_v23, %v3104_v38  ;;  %v707_v25 = vpop.f32.mrb[21].mxu0  ;;  %v779_v26 = vadd.f32 %v778_v33, %v3111_v36  ;;  %v780_v1 = vpop.f32.mrb[21].mxu1 }
 0x14a   :  { %v708_v30 = vadd.f32 %v707_v25, %v3108_v28  ;;  %v709_v39 = vpop.f32.mrb[22].mxu0  ;;  %v781_v24 = vadd.f32 %v780_v1, %v3114_v35  ;;  %v782_v11 = vpop.f32.mrb[22].mxu1 }
 0x14b   :  { %v710_v12 = vadd.f32 %v709_v39, %v3104_v38  ;;  %v711_v45 = vpop.f32.mrb[23].mxu0  ;;  %v3146_v32 = vadd.f32 %v706_v22, %v3078_v58  ;;  %v783_v34 = vadd.f32 %v782_v11, %v3111_v36  ;;  %v784_v49 = vpop.f32.mrb[23].mxu1  ;;  %v3151_v44 = vadd.f32 %v779_v26, %v3087_v41 }
 0x14c   :  { %v712_v31 = vadd.f32 %v711_v45, %v3108_v28  ;;  %v3154_v43 = vadd.f32 %v708_v30, %v3084_v6  ;;  %v785_v23 = vadd.f32 %v784_v49, %v3114_v35  ;;  %v3161_v25 = vadd.f32 %v781_v24, %v3090_v40 }
 0x14d   :  { %3745 = vst [vmem:[#allocation45_spill] sm:$0xff] %v3146_v32  ;;  %3746 = vst [vmem:[#allocation46_spill] sm:$0xff] %v3151_v44  ;;  %v3158_v33 = vadd.f32 %v710_v12, %v3069_v8  ;;  %v3164_v58 = vadd.f32 %v783_v34, %v3075_v48 }
 0x14e   :  { %3747 = vst [vmem:[#allocation47_spill] sm:$0xff] %v3154_v43  ;;  %3749 = vst [vmem:[#allocation49_spill] sm:$0xff] %v3161_v25  ;;  %v3167_v22 = vadd.f32 %v712_v31, %v3072_v46  ;;  %v3170_v41 = vadd.f32 %v785_v23, %v3081_v2 }
 0x14f   :  { %3748 = vst [vmem:[#allocation48_spill] sm:$0xff] %v3158_v33  ;;  %3750 = vst [vmem:[#allocation50_spill] sm:$0xff] %v3164_v58 }
 0x150   :  { %3751 = vst [vmem:[#allocation51_spill] sm:$0xff] %v3167_v22  ;;  %3752 = vst [vmem:[#allocation52_spill] sm:$0xff] %v3170_v41  ;;  %v715_v26 = vpop.f32.mrb[24].mxu0  ;;  %v788_v30 = vpop.f32.mrb[24].mxu1 }
 0x151   :  { %v716_v6 = vadd.f32 %v715_v26, %v3104_v38  ;;  %v717_v1 = vpop.f32.mrb[25].mxu0  ;;  %v789_v8 = vadd.f32 %v788_v30, %v3111_v36  ;;  %v790_v40 = vpop.f32.mrb[25].mxu1 }
 0x152   :  { %v718_v39 = vadd.f32 %v717_v1, %v3108_v28  ;;  %v719_v24 = vpop.f32.mrb[26].mxu0  ;;  %v791_v48 = vadd.f32 %v790_v40, %v3114_v35  ;;  %v792_v46 = vpop.f32.mrb[26].mxu1 }
 0x153   :  { %v720_v12 = vadd.f32 %v719_v24, %v3104_v38  ;;  %v721_v11 = vpop.f32.mrb[27].mxu0  ;;  %v3178_v2 = vadd.f32 %v716_v6, %v3054_v47  ;;  %v793_v45 = vadd.f32 %v792_v46, %v3111_v36  ;;  %v794_v31 = vpop.f32.mrb[27].mxu1  ;;  %v3183_v49 = vadd.f32 %v789_v8, %v3063_v62 }
 0x154   :  { %v722_v34 = vadd.f32 %v721_v11, %v3108_v28  ;;  %v3186_v23 = vadd.f32 %v718_v39, %v3060_v61  ;;  %v795_v26 = vadd.f32 %v794_v31, %v3114_v35  ;;  %v3193_v1 = vadd.f32 %v791_v48, %v3066_v4 }
 0x155   :  { %v3190_v30 = vadd.f32 %v720_v12, %v3045_v5  ;;  %v3196_v47 = vadd.f32 %v793_v45, %v3051_v42  ;;  %v550_v5 = vadd.f32 %v3012_v51, %v3018_v53  ;;  %v552_v4 = vadd.f32 %v3020_v54, %v3028_v57 }
 0x156   :  { %v3199_v6 = vadd.f32 %v722_v34, %v3048_v9  ;;  %v3202_v62 = vadd.f32 %v795_v26, %v3057_v50  ;;  %v623_v50 = vadd.f32 %v3022_v55, %v3015_v52  ;;  %v625_v52 = vadd.f32 %v3030_v59, %v3025_v56 }
 0x158   :  { %v725_v8 = vpop.f32.mrb[28].mxu0  ;;  %v798_v39 = vpop.f32.mrb[28].mxu1 }
 0x159   :  { %v726_v61 = vadd.f32 %v725_v8, %v3104_v38  ;;  %v727_v40 = vpop.f32.mrb[29].mxu0  ;;  %v799_v42 = vadd.f32 %v798_v39, %v3111_v36  ;;  %v800_v9 = vpop.f32.mrb[29].mxu1 }
 0x15a   :  { %v728_v24 = vadd.f32 %v727_v40, %v3108_v28  ;;  %v729_v48 = vpop.f32.mrb[30].mxu0  ;;  %v801_v12 = vadd.f32 %v800_v9, %v3114_v35  ;;  %v802_v11 = vpop.f32.mrb[30].mxu1 }
 0x15b   :  { %v730_v46 = vadd.f32 %v729_v48, %v3104_v38  ;;  %v731_v45 = vpop.f32.mrb[31].mxu0  ;;  %v3216_v51 = vadd.f32 %v726_v61, %v3033_v60  ;;  %v803_v53 = vadd.f32 %v802_v11, %v3111_v36  ;;  %v804_v57 = vpop.f32.mrb[31].mxu1  ;;  %v3221_v34 = vadd.f32 %v799_v42, %v3039_v0 }
 0x15c   :  { %v732_v54 = vadd.f32 %v731_v45, %v3108_v28  ;;  %v3224_v31 = vadd.f32 %v728_v24, %v3036_v63  ;;  %v805_v55 = vadd.f32 %v804_v57, %v3114_v35  ;;  %v3230_v60 = vadd.f32 %v801_v12, %v3042_v3 }
 0x15d   :  { %v886_v38 = vadd.f32 %v730_v46, %v550_v5  ;;  %v888_v26 = vadd.f32 %v803_v53, %v623_v50 }
 0x15e   :  { %v887_v36 = vadd.f32 %v732_v54, %v552_v4  ;;  %v889_v8 = vadd.f32 %v805_v55, %v625_v52 }
 0x160   :  { %v1116_v28 = vpop.f32.mrb[32].mxu0  ;;  %v1157_v39 = vpop.f32.mrb[32].mxu1 }
 0x161   :  { %v1164_v61 = vadd.f32 %v1116_v28, %v886_v38  ;;  %v1118_v0 = vpop.f32.mrb[33].mxu0  ;;  %v1166_v40 = vadd.f32 %v1157_v39, %v888_v26  ;;  %v1159_v63 = vpop.f32.mrb[33].mxu1  ;;  %v3754_v39 = vld [vmem:[#allocation13_spill] sm:$0xff] }
 0x162   :  { %v1165_v42 = vadd.f32 %v1118_v0, %v887_v36  ;;  %v1120_v24 = vpop.f32.mrb[34].mxu0  ;;  %v1167_v48 = vadd.f32 %v1159_v63, %v889_v8  ;;  %v1161_v59 = vpop.f32.mrb[34].mxu1  ;;  %v3755_v0 = vld [vmem:[#allocation14_spill] sm:$0xff]  ;;  %v3758_v63 = vld [vmem:[#allocation17_spill] sm:$0xff] }
 0x163   :  { %v2345_v9 = vmul.f32 -1.442695, %v1164_v61  ;;  %v1121_v56 = vpop.f32.mrb[35].mxu0  ;;  %v1162_v5 = vpop.f32.mrb[35].mxu1  ;;  %v3753_v61 = vmov 0   ;;  %v3759_v24 = vld [vmem:[#allocation18_spill] sm:$0xff] }
 0x164   :  { %v2346_v35 = vmul.f32 -1.442695, %v1165_v42  ;;  %v2347_v3 = vmul.f32 -1.442695, %v1167_v48  ;;  %v3757_v42 = vld [vmem:[#allocation16_spill] sm:$0xff]  ;;  %v3762_v56 = vld [vmem:[#allocation21_spill] sm:$0xff] }
 0x165   :  { %2511 = vpow2.f32 %v2345_v9  ;;  %v3760_v9 = vld [vmem:[#allocation19_spill] sm:$0xff]  ;;  %v3761_v48 = vld [vmem:[#allocation20_spill] sm:$0xff]  ;;  %v3763_v59 = vld [vmem:[#allocation22_spill] sm:$0xff] }
 0x166   :  { %2513 = vpow2.f32 %v2346_v35  ;;  %v3764_v35 = vld [vmem:[#allocation23_spill] sm:$0xff]  ;;  %v3765_v5 = vld [vmem:[#allocation24_spill] sm:$0xff] }
 0x167   :  { %2515 = vpow2.f32 %v2347_v3  ;;  %v3766_v3 = vld [vmem:[#allocation25_spill] sm:$0xff] }
 0x168   :  { %2517 = vtanh.f32 %v1166_v40  ;;  %v3756_v40 = vld [vmem:[#allocation15_spill] sm:$0xff] }
 0x16f   :  { %v2512_v50 = vpop.eup %2511 }
 0x170   :  { %v2514_v4 = vpop.eup %2513  ;;  %v1171_v12 = vadd.f32 1.0, %v2512_v50  ;;  %v3767_v50 = vld [vmem:[#allocation26_spill] sm:$0xff] }
 0x171   :  { %v1177_v46 = vadd.f32 1.0, %v2514_v4  ;;  %v2516_v11 = vpop.eup %2515  ;;  %v3768_v4 = vld [vmem:[#allocation27_spill] sm:$0xff] }
 0x172   :  { %2519 = vrcp.f32 %v1171_v12  ;;  %v2518_v45 = vpop.eup %2517  ;;  %v1184_v52 = vadd.f32 1.0, %v2516_v11  ;;  %v3769_v12 = vld [vmem:[#allocation28_spill] sm:$0xff]  ;;  %v3771_v11 = vld [vmem:[#allocation30_spill] sm:$0xff] }
 0x173   :  { %2521 = vrcp.f32 %v1177_v46  ;;  %v3770_v46 = vld [vmem:[#allocation29_spill] sm:$0xff] }
 0x174   :  { %2523 = vrcp.f32 %v1184_v52  ;;  %v3776_v52 = vld [vmem:[#allocation35_spill] sm:$0xff] }
 0x17c   :  { %v2520_v53 = vpop.eup %2519 }
 0x17d   :  { %v2522_v54 = vpop.eup %2521  ;;  %v1188_v57 = vmul.f32 %v2520_v53, %v2518_v45  ;;  %v3772_v45 = vld [vmem:[#allocation31_spill] sm:$0xff]  ;;  %v3773_v53 = vld [vmem:[#allocation32_spill] sm:$0xff] }
 0x17e   :  { %v1187_v55 = vmul.f32 0.0, %v2522_v54  ;;  %v2524_v26 = vpop.eup %2523  ;;  %v3774_v54 = vld [vmem:[#allocation33_spill] sm:$0xff] }
 0x180   :  { %v3232_v38 = vadd.f32 %v1188_v57, %v1187_v55  ;;  %v3775_v57 = vld [vmem:[#allocation34_spill] sm:$0xff]  ;;  %v3777_v55 = vld [vmem:[#allocation36_spill] sm:$0xff] }
 0x182   :  { %2525 = vtanh.f32 %v3232_v38 }
 0x18c   :  { %v2526_v36 = vpop.eup %2525 }
 0x18d   :  { %v3235_v8 = vmul.f32 %v2526_v36, %v2524_v26  ;;  %v3778_v26 = vld [vmem:[#allocation11_spill] sm:$0xff]  ;;  %v3779_v36 = vld [vmem:[#allocation12_spill] sm:$0xff] }
 0x18f   :  { %v1217_v28 = vpack.c.bf16 %v3235_v8, %v3235_v8 }
 0x191   :  { %1251 = vmatmul.mubr.bf16.vlgmr.msra.gmra.mrb[36].mxu0 %v1217_v28  ;;  %1292 = vmatmul.mubr.bf16.vlgmr.msra.gmra.mrb[36].mxu1 %v1217_v28  ;;  %v3780_v28 = vld [vmem:[#allocation10_spill] sm:$0xff] }
 0x192   :  { %1355 = vmatpush1.bf16.msra.mxu0 %v2852_v13  ;;  %1396 = vmatpush1.bf16.msra.mxu1 %v2855_v14  ;;  %vm1464_vm2 = vcmp.eq.s32.totalorder %v3780_v28, 3 }
 0x193   :  { %1356 = vmatprep.subr.bf16.mxu0 %v2857_v15  ;;  %1397 = vmatprep.subr.bf16.mxu1 %v2860_v16  ;;  %v1465_v37 = vsel %vm1464_vm2, 1, %v3753_v61  ;;  %vm2230_vm2 = vcmask 7168  }
 0x194   :  { %1386 = vmatprep.mubr.bf16.mxu0 %v3753_v61  ;;  %1427 = vmatprep.mubr.bf16.mxu1 %v3753_v61 }
 0x195   :  { %1467 = vperm.xlu1 %2458, %v1465_v37  }
 0x196   :  { %1357 = vmatpush1.bf16.msra.mxu0 %v2865_v17  ;;  %1398 = vmatpush1.bf16.msra.mxu1 %v2869_v18 }
 0x197   :  { %1358 = vmatprep.subr.bf16.mxu0 %v3754_v39  ;;  %1399 = vmatprep.subr.bf16.mxu1 %v3755_v0 }
 0x19a   :  { %1359 = vmatpush1.bf16.msra.mxu0 %v3756_v40  ;;  %1400 = vmatpush1.bf16.msra.mxu1 %v3757_v42 }
 0x19b   :  { %1360 = vmatprep.subr.bf16.mxu0 %v3758_v63  ;;  %1401 = vmatprep.subr.bf16.mxu1 %v3759_v24 }
 0x19e   :  { %1361 = vmatpush1.bf16.msra.mxu0 %v3760_v9  ;;  %1402 = vmatpush1.bf16.msra.mxu1 %v3761_v48 }
 0x19f   :  { %1362 = vmatprep.subr.bf16.mxu0 %v3762_v56  ;;  %1403 = vmatprep.subr.bf16.mxu1 %v3763_v59 }
 0x1a2   :  { %1363 = vmatpush1.bf16.msra.mxu0 %v3764_v35  ;;  %1404 = vmatpush1.bf16.msra.mxu1 %v3765_v5 }
 0x1a3   :  { %1364 = vmatprep.subr.bf16.mxu0 %v3766_v3  ;;  %1405 = vmatprep.subr.bf16.mxu1 %v3767_v50 }
 0x1a6   :  { %1365 = vmatpush1.bf16.msra.mxu0 %v3768_v4  ;;  %1406 = vmatpush1.bf16.msra.mxu1 %v3769_v12 }
 0x1a7   :  { %1366 = vmatprep.subr.bf16.mxu0 %v3770_v46  ;;  %1407 = vmatprep.subr.bf16.mxu1 %v3771_v11 }
 0x1aa   :  { %1367 = vmatpush1.bf16.msra.mxu0 %v3772_v45  ;;  %1408 = vmatpush1.bf16.msra.mxu1 %v3773_v53 }
 0x1ab   :  { %1368 = vmatprep.subr.bf16.mxu0 %v3774_v54  ;;  %1409 = vmatprep.subr.bf16.mxu1 %v3775_v57 }
 0x1ae   :  { %1369 = vmatpush1.bf16.msra.mxu0 %v3776_v52  ;;  %1410 = vmatpush1.bf16.msra.mxu1 %v3777_v55 }
 0x1af   :  { %1490 = vmatprep.subr.bf16.mxu0 %v3778_v26  ;;  %1531 = vmatprep.subr.bf16.mxu1 %v3779_v36 }
 0x264   :  { %v1252_v27 = vpop.f32.mrb[36].mxu0  ;;  %v1293_v7 = vpop.f32.mrb[36].mxu1 }
 0x265   :  { %v1300_v21 = vadd.f32 %v1252_v27, %v3216_v51  ;;  %v1302_v10 = vadd.f32 %v1293_v7, %v3221_v34  ;;  %v1254_v29 = vpop.f32.mrb[37].mxu0  ;;  %v1295_v19 = vpop.f32.mrb[37].mxu1 }
 0x266   :  { %v1301_v20 = vadd.f32 %v1254_v29, %v3224_v31  ;;  %v1303_v25 = vadd.f32 %v1295_v19, %v3230_v60  ;;  %v1256_v43 = vpop.f32.mrb[38].mxu0  ;;  %v1297_v44 = vpop.f32.mrb[38].mxu1  ;;  %v3323_v60 = vld [vmem:[%s3652_s6] sm:$0xff] }
 0x267   :  { %v2348_v32 = vmul.f32 -1.442695, %v1300_v21  ;;  %v1257_v41 = vpop.f32.mrb[39].mxu0  ;;  %v1298_v28 = vpop.f32.mrb[39].mxu1  ;;  %vm1600_vm5 = vcmp.eq.s32.totalorder %v3323_v60, 4  ;;  %vm1730_vm7 = vcmp.eq.s32.totalorder %v3323_v60, 5 }
 0x268   :  { %v2349_v22 = vmul.f32 -1.442695, %v1301_v20  ;;  %v2350_v37 = vmul.f32 -1.442695, %v1303_v25  ;;  %vm1860_vm9 = vcmp.eq.s32.totalorder %v3323_v60, 6  ;;  %vm1990_vm11 = vcmp.eq.s32.totalorder %v3323_v60, 7 }
 0x269   :  { %2527 = vpow2.f32 %v2348_v32  ;;  %v1196_v32 = vpop.permute.xlu0 %1195  ;;  %vm2120_vm13 = vcmp.eq.s32.totalorder %v3323_v60, 8 }
 0x26a   :  { %2529 = vpow2.f32 %v2349_v22  ;;  %vm1197_vm3 = vcmp.eq.s32.totalorder %v1196_v32, 1 }
 0x26b   :  { %2531 = vpow2.f32 %v2350_v37  ;;  %v1198_v22 = vsel %vm1197_vm3, %v3235_v8, 0.0 }
 0x26c   :  { %2533 = vtanh.f32 %v1302_v10 }
 0x26d   :  { %v1332_v25 = vpop.permute.xlu0 %1331 }
 0x26e   :  { %vm1333_vm4 = vcmp.eq.s32.totalorder %v1332_v25, 1 }
 0x273   :  { %v2528_v58 = vpop.eup %2527 }
 0x274   :  { %v2530_v33 = vpop.eup %2529  ;;  %v1307_v27 = vadd.f32 1.0, %v2528_v58 }
 0x275   :  { %v1313_v7 = vadd.f32 1.0, %v2530_v33  ;;  %v2532_v29 = vpop.eup %2531 }
 0x276   :  { %2535 = vrcp.f32 %v1307_v27  ;;  %v2534_v51 = vpop.eup %2533  ;;  %v1320_v21 = vadd.f32 1.0, %v2532_v29 }
 0x277   :  { %2537 = vrcp.f32 %v1313_v7 }
 0x278   :  { %2539 = vrcp.f32 %v1320_v21 }
 0x280   :  { %v2536_v19 = vpop.eup %2535 }
 0x281   :  { %v2538_v43 = vpop.eup %2537  ;;  %v1324_v44 = vmul.f32 %v2536_v19, %v2534_v51 }
 0x282   :  { %v1323_v41 = vmul.f32 %v2538_v43, %v3232_v38  ;;  %v2540_v58 = vpop.eup %2539  ;;  %v1601_v38 = vsel %vm1600_vm5, 1, %v3753_v61 }
 0x283   :  { %1603 = vperm.xlu1 %2458, %v1601_v38  }
 0x284   :  { %v3280_v20 = vadd.f32 %v1324_v44, %v1323_v41 }
 0x286   :  { %2541 = vtanh.f32 %v3280_v20 }
 0x290   :  { %v2542_v10 = vpop.eup %2541 }
 0x291   :  { %v1327_v33 = vmul.f32 %v2542_v10, %v2540_v58 }
 0x293   :  { %v3284_v34 = vsel %vm1333_vm4, %v1327_v33, %v1198_v22  ;;  %v1353_v31 = vpack.c.bf16 %v1327_v33, %v1327_v33 }
 0x295   :  { %1387 = vmatmul.mubr.bf16.vlgmr.msra.gmra.mrb[40].mxu0 %v1353_v31  ;;  %1428 = vmatmul.mubr.bf16.vlgmr.msra.gmra.mrb[40].mxu1 %v1353_v31 }
 0x296   :  { %1491 = vmatpush1.bf16.msra.mxu0 %v2852_v13  ;;  %1532 = vmatpush1.bf16.msra.mxu1 %v2855_v14 }
 0x297   :  { %1492 = vmatprep.subr.bf16.mxu0 %v2857_v15  ;;  %1533 = vmatprep.subr.bf16.mxu1 %v2860_v16 }
 0x298   :  { %1522 = vmatprep.mubr.bf16.mxu0 %v3753_v61  ;;  %1563 = vmatprep.mubr.bf16.mxu1 %v3753_v61 }
 0x29a   :  { %1493 = vmatpush1.bf16.msra.mxu0 %v2865_v17  ;;  %1534 = vmatpush1.bf16.msra.mxu1 %v2869_v18 }
 0x29b   :  { %1494 = vmatprep.subr.bf16.mxu0 %v3754_v39  ;;  %1535 = vmatprep.subr.bf16.mxu1 %v3755_v0 }
 0x29e   :  { %1495 = vmatpush1.bf16.msra.mxu0 %v3756_v40  ;;  %1536 = vmatpush1.bf16.msra.mxu1 %v3757_v42 }
 0x29f   :  { %1496 = vmatprep.subr.bf16.mxu0 %v3758_v63  ;;  %1537 = vmatprep.subr.bf16.mxu1 %v3759_v24 }
 0x2a2   :  { %1497 = vmatpush1.bf16.msra.mxu0 %v3760_v9  ;;  %1538 = vmatpush1.bf16.msra.mxu1 %v3761_v48 }
 0x2a3   :  { %1498 = vmatprep.subr.bf16.mxu0 %v3762_v56  ;;  %1539 = vmatprep.subr.bf16.mxu1 %v3763_v59 }
 0x2a6   :  { %1499 = vmatpush1.bf16.msra.mxu0 %v3764_v35  ;;  %1540 = vmatpush1.bf16.msra.mxu1 %v3765_v5 }
 0x2a7   :  { %1500 = vmatprep.subr.bf16.mxu0 %v3766_v3  ;;  %1541 = vmatprep.subr.bf16.mxu1 %v3767_v50 }
 0x2aa   :  { %1501 = vmatpush1.bf16.msra.mxu0 %v3768_v4  ;;  %1542 = vmatpush1.bf16.msra.mxu1 %v3769_v12 }
 0x2ab   :  { %1502 = vmatprep.subr.bf16.mxu0 %v3770_v46  ;;  %1543 = vmatprep.subr.bf16.mxu1 %v3771_v11 }
 0x2ae   :  { %1503 = vmatpush1.bf16.msra.mxu0 %v3772_v45  ;;  %1544 = vmatpush1.bf16.msra.mxu1 %v3773_v53 }
 0x2af   :  { %1504 = vmatprep.subr.bf16.mxu0 %v3774_v54  ;;  %1545 = vmatprep.subr.bf16.mxu1 %v3775_v57 }
 0x2b2   :  { %1505 = vmatpush1.bf16.msra.mxu0 %v3776_v52  ;;  %1546 = vmatpush1.bf16.msra.mxu1 %v3777_v55 }
 0x2b3   :  { %1620 = vmatprep.subr.bf16.mxu0 %v3778_v26  ;;  %1661 = vmatprep.subr.bf16.mxu1 %v3779_v36 }
 0x368   :  { %v1388_v8 = vpop.f32.mrb[40].mxu0  ;;  %v1429_v28 = vpop.f32.mrb[40].mxu1 }
 0x369   :  { %v1436_v37 = vadd.f32 %v1388_v8, %v3190_v30  ;;  %v1438_v27 = vadd.f32 %v1429_v28, %v3196_v47  ;;  %v1390_v7 = vpop.f32.mrb[41].mxu0  ;;  %v1431_v26 = vpop.f32.mrb[41].mxu1 }
 0x36a   :  { %v1437_v36 = vadd.f32 %v1390_v7, %v3199_v6  ;;  %v1439_v29 = vadd.f32 %v1431_v26, %v3202_v62  ;;  %v1392_v51 = vpop.f32.mrb[42].mxu0  ;;  %v1433_v19 = vpop.f32.mrb[42].mxu1 }
 0x36b   :  { %v2351_v43 = vmul.f32 -1.442695, %v1436_v37  ;;  %v1393_v44 = vpop.f32.mrb[43].mxu0  ;;  %v1434_v21 = vpop.f32.mrb[43].mxu1  ;;  %v3392_v51 = vld [vmem:[#allocation6 + $0x8] ss:$16 sps:$4 sm:$0xff]  }
 0x36c   :  { %v2352_v41 = vmul.f32 -1.442695, %v1437_v36  ;;  %v2353_v32 = vmul.f32 -1.442695, %v1439_v29  ;;  %v1468_v28 = vpop.permute.xlu1 %1467  ;;  %v3389_v29 = vld [vmem:[#allocation6] ss:$16 sps:$4 sm:$0xff]  }
 0x36d   :  { %2543 = vpow2.f32 %v2351_v43  ;;  %vm1469_vm6 = vcmp.eq.s32.totalorder %v1468_v28, 1  ;;  %v3395_v19 = vld [vmem:[#allocation6 + $0x24] ss:$16 sps:$4 sm:$0xff]   ;;  %v3398_v43 = vld [vmem:[#allocation6 + $0x2c] ss:$16 sps:$4 sm:$0xff]  }
 0x36e   :  { %2545 = vpow2.f32 %v2352_v41  ;;  %v3403_v44 = vld [vmem:[#allocation6 + $0x20] ss:$16 sps:$4 sm:$0xff]   ;;  %v3406_v21 = vld [vmem:[#allocation6 + $0x28] ss:$16 sps:$4 sm:$0xff]   ;;  %v3409_v41 = vld [vmem:[#allocation6 + $0x44] ss:$16 sps:$4 sm:$0xff]  }
 0x36f   :  { %2547 = vpow2.f32 %v2353_v32  ;;  %v3412_v32 = vld [vmem:[#allocation6 + $0x4c] ss:$16 sps:$4 sm:$0xff]   ;;  %v3451_v28 = vld [vmem:[#allocation6 + $0xa0] ss:$16 sps:$4 sm:$0xff]  }
 0x370   :  { %2549 = vtanh.f32 %v1438_v27 }
 0x377   :  { %v2544_v25 = vpop.eup %2543 }
 0x378   :  { %v2546_v58 = vpop.eup %2545  ;;  %v1443_v30 = vadd.f32 1.0, %v2544_v25  ;;  %v3415_v25 = vld [vmem:[#allocation6 + $0x40] ss:$16 sps:$4 sm:$0xff]  }
 0x379   :  { %v1449_v47 = vadd.f32 1.0, %v2546_v58  ;;  %v2548_v6 = vpop.eup %2547  ;;  %v3418_v58 = vld [vmem:[#allocation6 + $0x48] ss:$16 sps:$4 sm:$0xff]  }
 0x37a   :  { %2551 = vrcp.f32 %v1443_v30  ;;  %v2550_v10 = vpop.eup %2549  ;;  %v1456_v31 = vadd.f32 1.0, %v2548_v6  ;;  %v3421_v30 = vld [vmem:[#allocation6 + $0x64] ss:$16 sps:$4 sm:$0xff]   ;;  %v3427_v6 = vld [vmem:[#allocation6 + $0x60] ss:$16 sps:$4 sm:$0xff]  }
 0x37b   :  { %2553 = vrcp.f32 %v1449_v47  ;;  %v3424_v47 = vld [vmem:[#allocation6 + $0x6c] ss:$16 sps:$4 sm:$0xff]  }
 0x37c   :  { %2555 = vrcp.f32 %v1456_v31  ;;  %v3442_v31 = vld [vmem:[#allocation6 + $0x88] ss:$16 sps:$4 sm:$0xff]  }
 0x384   :  { %v2552_v62 = vpop.eup %2551 }
 0x385   :  { %v2554_v33 = vpop.eup %2553  ;;  %v1460_v22 = vmul.f32 %v2552_v62, %v2550_v10  ;;  %v3430_v10 = vld [vmem:[#allocation6 + $0x68] ss:$16 sps:$4 sm:$0xff]   ;;  %v3433_v62 = vld [vmem:[#allocation6 + $0x84] ss:$16 sps:$4 sm:$0xff]  }
 0x386   :  { %v1459_v38 = vmul.f32 %v2554_v33, %v3280_v20  ;;  %v2556_v37 = vpop.eup %2555  ;;  %v3436_v33 = vld [vmem:[#allocation6 + $0x8c] ss:$16 sps:$4 sm:$0xff]  }
 0x388   :  { %v3332_v8 = vadd.f32 %v1460_v22, %v1459_v38  ;;  %v3439_v22 = vld [vmem:[#allocation6 + $0x80] ss:$16 sps:$4 sm:$0xff]   ;;  %v3445_v38 = vld [vmem:[#allocation6 + $0xa4] ss:$16 sps:$4 sm:$0xff]  }
 0x38a   :  { %2557 = vtanh.f32 %v3332_v8 }
 0x394   :  { %v2558_v7 = vpop.eup %2557 }
 0x395   :  { %v1463_v27 = vmul.f32 %v2558_v7, %v2556_v37  ;;  %v3454_v37 = vld [vmem:[#allocation6 + $0xa8] ss:$16 sps:$4 sm:$0xff]   ;;  %v3457_v7 = vld [vmem:[#allocation6 + $0xc4] ss:$16 sps:$4 sm:$0xff]  }
 0x397   :  { %v3336_v26 = vsel %vm1469_vm6, %v1463_v27, %v3284_v34  ;;  %v1489_v36 = vpack.c.bf16 %v1463_v27, %v1463_v27  ;;  %v3460_v27 = vld [vmem:[#allocation6 + $0xcc] ss:$16 sps:$4 sm:$0xff]  }
 0x399   :  { %1523 = vmatmul.mubr.bf16.vlgmr.msra.gmra.mrb[44].mxu0 %v1489_v36  ;;  %1564 = vmatmul.mubr.bf16.vlgmr.msra.gmra.mrb[44].mxu1 %v1489_v36  ;;  %v3466_v36 = vld [vmem:[#allocation6 + $0xc8] ss:$16 sps:$4 sm:$0xff]  }
 0x39a   :  { %1621 = vmatpush1.bf16.msra.mxu0 %v2852_v13  ;;  %1662 = vmatpush1.bf16.msra.mxu1 %v2855_v14  ;;  %v3370_v13 = vld [vmem:[#allocation6 + $0x4] ss:$16 sps:$4 sm:$0xff]   ;;  %v3373_v14 = vld [vmem:[#allocation6 + $0xc] ss:$16 sps:$4 sm:$0xff]  }
 0x39b   :  { %1622 = vmatprep.subr.bf16.mxu0 %v2857_v15  ;;  %1663 = vmatprep.subr.bf16.mxu1 %v2860_v16  ;;  %v1731_v15 = vsel %vm1730_vm7, 1, %v3753_v61 }
 0x39c   :  { %1652 = vmatprep.mubr.bf16.mxu0 %v3753_v61  ;;  %1693 = vmatprep.mubr.bf16.mxu1 %v3753_v61 }
 0x39d   :  { %1733 = vperm.xlu0 %2457, %v1731_v15   ;;  %v3469_v15 = vld [vmem:[#allocation6 + $0xe4] ss:$16 sps:$4 sm:$0xff]  }
 0x39e   :  { %1623 = vmatpush1.bf16.msra.mxu0 %v2865_v17  ;;  %1664 = vmatpush1.bf16.msra.mxu1 %v2869_v18 }
 0x39f   :  { %1624 = vmatprep.subr.bf16.mxu0 %v3754_v39  ;;  %1665 = vmatprep.subr.bf16.mxu1 %v3755_v0 }
 0x3a2   :  { %1625 = vmatpush1.bf16.msra.mxu0 %v3756_v40  ;;  %1666 = vmatpush1.bf16.msra.mxu1 %v3757_v42 }
 0x3a3   :  { %1626 = vmatprep.subr.bf16.mxu0 %v3758_v63  ;;  %1667 = vmatprep.subr.bf16.mxu1 %v3759_v24 }
 0x3a6   :  { %1627 = vmatpush1.bf16.msra.mxu0 %v3760_v9  ;;  %1668 = vmatpush1.bf16.msra.mxu1 %v3761_v48 }
 0x3a7   :  { %1628 = vmatprep.subr.bf16.mxu0 %v3762_v56  ;;  %1669 = vmatprep.subr.bf16.mxu1 %v3763_v59 }
 0x3aa   :  { %1629 = vmatpush1.bf16.msra.mxu0 %v3764_v35  ;;  %1670 = vmatpush1.bf16.msra.mxu1 %v3765_v5 }
 0x3ab   :  { %1630 = vmatprep.subr.bf16.mxu0 %v3766_v3  ;;  %1671 = vmatprep.subr.bf16.mxu1 %v3767_v50 }
 0x3ae   :  { %1631 = vmatpush1.bf16.msra.mxu0 %v3768_v4  ;;  %1672 = vmatpush1.bf16.msra.mxu1 %v3769_v12 }
 0x3af   :  { %1632 = vmatprep.subr.bf16.mxu0 %v3770_v46  ;;  %1673 = vmatprep.subr.bf16.mxu1 %v3771_v11 }
 0x3b2   :  { %1633 = vmatpush1.bf16.msra.mxu0 %v3772_v45  ;;  %1674 = vmatpush1.bf16.msra.mxu1 %v3773_v53 }
 0x3b3   :  { %1634 = vmatprep.subr.bf16.mxu0 %v3774_v54  ;;  %1675 = vmatprep.subr.bf16.mxu1 %v3775_v57  ;;  %v1604_v54 = vpop.permute.xlu1 %1603 }
 0x3b4   :  { %vm1605_vm8 = vcmp.eq.s32.totalorder %v1604_v54, 1 }
 0x3b6   :  { %1635 = vmatpush1.bf16.msra.mxu0 %v3776_v52  ;;  %1676 = vmatpush1.bf16.msra.mxu1 %v3777_v55 }
 0x3b7   :  { %1750 = vmatprep.subr.bf16.mxu0 %v3370_v13  ;;  %1791 = vmatprep.subr.bf16.mxu1 %v3373_v14 }
 0x46c   :  { %v1524_v16 = vpop.f32.mrb[44].mxu0  ;;  %v1565_v17 = vpop.f32.mrb[44].mxu1 }
 0x46d   :  { %v1572_v18 = vadd.f32 %v1524_v16, %v3178_v2  ;;  %v1574_v39 = vadd.f32 %v1565_v17, %v3183_v49  ;;  %v1526_v0 = vpop.f32.mrb[45].mxu0  ;;  %v1567_v40 = vpop.f32.mrb[45].mxu1  ;;  %v3472_v16 = vld [vmem:[#allocation6 + $0xec] ss:$16 sps:$4 sm:$0xff]   ;;  %v3475_v17 = vld [vmem:[#allocation6 + $0xe0] ss:$16 sps:$4 sm:$0xff]  }
 0x46e   :  { %v1573_v42 = vadd.f32 %v1526_v0, %v3186_v23  ;;  %v1575_v63 = vadd.f32 %v1567_v40, %v3193_v1  ;;  %v1528_v24 = vpop.f32.mrb[46].mxu0  ;;  %v1569_v9 = vpop.f32.mrb[46].mxu1 }
 0x46f   :  { %v2354_v48 = vmul.f32 -1.442695, %v1572_v18  ;;  %v1529_v56 = vpop.f32.mrb[47].mxu0  ;;  %v1570_v59 = vpop.f32.mrb[47].mxu1  ;;  %v3478_v18 = vld [vmem:[#allocation6 + $0xe8] ss:$16 sps:$4 sm:$0xff]  }
 0x470   :  { %v2355_v35 = vmul.f32 -1.442695, %v1573_v42  ;;  %v2356_v5 = vmul.f32 -1.442695, %v1575_v63  ;;  %v3781_v42 = vld [vmem:[#allocation48_spill] sm:$0xff]  ;;  %v3782_v24 = vld [vmem:[#allocation50_spill] sm:$0xff] }
 0x471   :  { %2559 = vpow2.f32 %v2354_v48  ;;  %v3783_v59 = vld [vmem:[#allocation51_spill] sm:$0xff] }
 0x472   :  { %2561 = vpow2.f32 %v2355_v35 }
 0x473   :  { %2563 = vpow2.f32 %v2356_v5  ;;  %v3784_v5 = vld [vmem:[#allocation52_spill] sm:$0xff] }
 0x474   :  { %2565 = vtanh.f32 %v1574_v39  ;;  %v1861_v39 = vsel %vm1860_vm9, 1, %v3753_v61 }
 0x475   :  { %1863 = vperm.xlu1 %2458, %v1861_v39  }
 0x47b   :  { %v2560_v3 = vpop.eup %2559 }
 0x47c   :  { %v2562_v50 = vpop.eup %2561  ;;  %v1579_v2 = vadd.f32 1.0, %v2560_v3 }
 0x47d   :  { %v1585_v49 = vadd.f32 1.0, %v2562_v50  ;;  %v2564_v23 = vpop.eup %2563 }
 0x47e   :  { %2567 = vrcp.f32 %v1579_v2  ;;  %v2566_v4 = vpop.eup %2565  ;;  %v1592_v11 = vadd.f32 1.0, %v2564_v23 }
 0x47f   :  { %2569 = vrcp.f32 %v1585_v49 }
 0x480   :  { %2571 = vrcp.f32 %v1592_v11 }
 0x488   :  { %v2568_v1 = vpop.eup %2567 }
 0x489   :  { %v2570_v12 = vpop.eup %2569  ;;  %v1596_v46 = vmul.f32 %v2568_v1, %v2566_v4 }
 0x48a   :  { %v1595_v45 = vmul.f32 %v2570_v12, %v3332_v8  ;;  %v2572_v57 = vpop.eup %2571  ;;  %v3448_v8 = vld [vmem:[#allocation6 + $0xac] ss:$16 sps:$4 sm:$0xff]  }
 0x48c   :  { %v3383_v53 = vadd.f32 %v1596_v46, %v1595_v45 }
 0x48e   :  { %2573 = vtanh.f32 %v3383_v53 }
 0x498   :  { %v2574_v52 = vpop.eup %2573 }
 0x499   :  { %v1599_v55 = vmul.f32 %v2574_v52, %v2572_v57 }
 0x49b   :  { %v3387_v20 = vsel %vm1605_vm8, %v1599_v55, %v3336_v26  ;;  %v1619_v34 = vpack.c.bf16 %v1599_v55, %v1599_v55  ;;  %v3463_v26 = vld [vmem:[#allocation6 + $0xc0] ss:$16 sps:$4 sm:$0xff]  }
 0x49d   :  { %1653 = vmatmul.mubr.bf16.vlgmr.msra.gmra.mrb[48].mxu0 %v1619_v34  ;;  %1694 = vmatmul.mubr.bf16.vlgmr.msra.gmra.mrb[48].mxu1 %v1619_v34 }
 0x49e   :  { %1751 = vmatpush1.bf16.msra.mxu0 %v3389_v29  ;;  %1792 = vmatpush1.bf16.msra.mxu1 %v3392_v51 }
 0x49f   :  { %1752 = vmatprep.subr.bf16.mxu0 %v3395_v19  ;;  %1793 = vmatprep.subr.bf16.mxu1 %v3398_v43 }
 0x4a0   :  { %1782 = vmatprep.mubr.bf16.mxu0 %v3753_v61  ;;  %1823 = vmatprep.mubr.bf16.mxu1 %v3753_v61 }
 0x4a2   :  { %1753 = vmatpush1.bf16.msra.mxu0 %v3403_v44  ;;  %1794 = vmatpush1.bf16.msra.mxu1 %v3406_v21 }
 0x4a3   :  { %1754 = vmatprep.subr.bf16.mxu0 %v3409_v41  ;;  %1795 = vmatprep.subr.bf16.mxu1 %v3412_v32 }
 0x4a6   :  { %1755 = vmatpush1.bf16.msra.mxu0 %v3415_v25  ;;  %1796 = vmatpush1.bf16.msra.mxu1 %v3418_v58 }
 0x4a7   :  { %1756 = vmatprep.subr.bf16.mxu0 %v3421_v30  ;;  %1797 = vmatprep.subr.bf16.mxu1 %v3424_v47 }
 0x4aa   :  { %1757 = vmatpush1.bf16.msra.mxu0 %v3427_v6  ;;  %1798 = vmatpush1.bf16.msra.mxu1 %v3430_v10 }
 0x4ab   :  { %1758 = vmatprep.subr.bf16.mxu0 %v3433_v62  ;;  %1799 = vmatprep.subr.bf16.mxu1 %v3436_v33 }
 0x4ae   :  { %1759 = vmatpush1.bf16.msra.mxu0 %v3439_v22  ;;  %1800 = vmatpush1.bf16.msra.mxu1 %v3442_v31 }
 0x4af   :  { %1760 = vmatprep.subr.bf16.mxu0 %v3445_v38  ;;  %1801 = vmatprep.subr.bf16.mxu1 %v3448_v8 }
 0x4b2   :  { %1761 = vmatpush1.bf16.msra.mxu0 %v3451_v28  ;;  %1802 = vmatpush1.bf16.msra.mxu1 %v3454_v37 }
 0x4b3   :  { %1762 = vmatprep.subr.bf16.mxu0 %v3457_v7  ;;  %1803 = vmatprep.subr.bf16.mxu1 %v3460_v27 }
 0x4b6   :  { %1763 = vmatpush1.bf16.msra.mxu0 %v3463_v26  ;;  %1804 = vmatpush1.bf16.msra.mxu1 %v3466_v36 }
 0x4b7   :  { %1764 = vmatprep.subr.bf16.mxu0 %v3469_v15  ;;  %1805 = vmatprep.subr.bf16.mxu1 %v3472_v16 }
 0x4ba   :  { %1765 = vmatpush1.bf16.msra.mxu0 %v3475_v17  ;;  %1806 = vmatpush1.bf16.msra.mxu1 %v3478_v18 }
 0x4bb   :  { %1880 = vmatprep.subr.bf16.mxu0 %v3370_v13  ;;  %1921 = vmatprep.subr.bf16.mxu1 %v3373_v14 }
 0x570   :  { %v1654_v0 = vpop.f32.mrb[48].mxu0  ;;  %v1695_v40 = vpop.f32.mrb[48].mxu1 }
 0x571   :  { %v1702_v63 = vadd.f32 %v1654_v0, %v3781_v42  ;;  %v1704_v9 = vadd.f32 %v1695_v40, %v3782_v24  ;;  %v1656_v48 = vpop.f32.mrb[49].mxu0  ;;  %v1697_v56 = vpop.f32.mrb[49].mxu1 }
 0x572   :  { %v1703_v35 = vadd.f32 %v1656_v48, %v3783_v59  ;;  %v1705_v3 = vadd.f32 %v1697_v56, %v3784_v5  ;;  %v1658_v50 = vpop.f32.mrb[50].mxu0  ;;  %v1699_v2 = vpop.f32.mrb[50].mxu1  ;;  %v3785_v5 = vld [vmem:[#allocation45_spill] sm:$0xff] }
 0x573   :  { %v2357_v49 = vmul.f32 -1.442695, %v1702_v63  ;;  %v1659_v23 = vpop.f32.mrb[51].mxu0  ;;  %v1700_v4 = vpop.f32.mrb[51].mxu1  ;;  %v3786_v50 = vld [vmem:[#allocation46_spill] sm:$0xff] }
 0x574   :  { %v2358_v1 = vmul.f32 -1.442695, %v1703_v35  ;;  %v2359_v12 = vmul.f32 -1.442695, %v1705_v3  ;;  %v1734_v63 = vpop.permute.xlu0 %1733  ;;  %v3787_v4 = vld [vmem:[#allocation47_spill] sm:$0xff] }
 0x575   :  { %2575 = vpow2.f32 %v2357_v49  ;;  %vm1735_vm10 = vcmp.eq.s32.totalorder %v1734_v63, 1 }
 0x576   :  { %2577 = vpow2.f32 %v2358_v1 }
 0x577   :  { %2579 = vpow2.f32 %v2359_v12  ;;  %v3788_v12 = vld [vmem:[#allocation49_spill] sm:$0xff] }
 0x578   :  { %2581 = vtanh.f32 %v1704_v9 }
 0x57f   :  { %v2576_v46 = vpop.eup %2575 }
 0x580   :  { %v2578_v11 = vpop.eup %2577  ;;  %v1709_v45 = vadd.f32 1.0, %v2576_v46 }
 0x581   :  { %v1715_v54 = vadd.f32 1.0, %v2578_v11  ;;  %v2580_v57 = vpop.eup %2579 }
 0x582   :  { %2583 = vrcp.f32 %v1709_v45  ;;  %v2582_v52 = vpop.eup %2581  ;;  %v1722_v0 = vadd.f32 1.0, %v2580_v57 }
 0x583   :  { %2585 = vrcp.f32 %v1715_v54 }
 0x584   :  { %2587 = vrcp.f32 %v1722_v0 }
 0x58c   :  { %v2584_v55 = vpop.eup %2583 }
 0x58d   :  { %v2586_v34 = vpop.eup %2585  ;;  %v1726_v39 = vmul.f32 %v2584_v55, %v2582_v52 }
 0x58e   :  { %v1725_v40 = vmul.f32 %v2586_v34, %v3383_v53  ;;  %v2588_v24 = vpop.eup %2587  ;;  %v1991_v53 = vsel %vm1990_vm11, 1, %v3753_v61 }
 0x58f   :  { %1993 = vperm.xlu0 %2457, %v1991_v53  }
 0x590   :  { %v3490_v42 = vadd.f32 %v1726_v39, %v1725_v40 }
 0x592   :  { %2589 = vtanh.f32 %v3490_v42 }
 0x59c   :  { %v2590_v48 = vpop.eup %2589 }
 0x59d   :  { %v1729_v9 = vmul.f32 %v2590_v48, %v2588_v24 }
 0x59f   :  { %v3494_v56 = vsel %vm1735_vm10, %v1729_v9, %v3387_v20  ;;  %v1749_v59 = vpack.c.bf16 %v1729_v9, %v1729_v9 }
 0x5a1   :  { %1783 = vmatmul.mubr.bf16.vlgmr.msra.gmra.mrb[52].mxu0 %v1749_v59  ;;  %1824 = vmatmul.mubr.bf16.vlgmr.msra.gmra.mrb[52].mxu1 %v1749_v59 }
 0x5a2   :  { %1881 = vmatpush1.bf16.msra.mxu0 %v3389_v29  ;;  %1922 = vmatpush1.bf16.msra.mxu1 %v3392_v51 }
 0x5a3   :  { %1882 = vmatprep.subr.bf16.mxu0 %v3395_v19  ;;  %1923 = vmatprep.subr.bf16.mxu1 %v3398_v43 }
 0x5a4   :  { %1912 = vmatprep.mubr.bf16.mxu0 %v3753_v61  ;;  %1953 = vmatprep.mubr.bf16.mxu1 %v3753_v61 }
 0x5a6   :  { %1883 = vmatpush1.bf16.msra.mxu0 %v3403_v44  ;;  %1924 = vmatpush1.bf16.msra.mxu1 %v3406_v21 }
 0x5a7   :  { %1884 = vmatprep.subr.bf16.mxu0 %v3409_v41  ;;  %1925 = vmatprep.subr.bf16.mxu1 %v3412_v32 }
 0x5aa   :  { %1885 = vmatpush1.bf16.msra.mxu0 %v3415_v25  ;;  %1926 = vmatpush1.bf16.msra.mxu1 %v3418_v58 }
 0x5ab   :  { %1886 = vmatprep.subr.bf16.mxu0 %v3421_v30  ;;  %1927 = vmatprep.subr.bf16.mxu1 %v3424_v47 }
 0x5ae   :  { %1887 = vmatpush1.bf16.msra.mxu0 %v3427_v6  ;;  %1928 = vmatpush1.bf16.msra.mxu1 %v3430_v10 }
 0x5af   :  { %1888 = vmatprep.subr.bf16.mxu0 %v3433_v62  ;;  %1929 = vmatprep.subr.bf16.mxu1 %v3436_v33 }
 0x5b2   :  { %1889 = vmatpush1.bf16.msra.mxu0 %v3439_v22  ;;  %1930 = vmatpush1.bf16.msra.mxu1 %v3442_v31 }
 0x5b3   :  { %1890 = vmatprep.subr.bf16.mxu0 %v3445_v38  ;;  %1931 = vmatprep.subr.bf16.mxu1 %v3448_v8 }
 0x5b6   :  { %1891 = vmatpush1.bf16.msra.mxu0 %v3451_v28  ;;  %1932 = vmatpush1.bf16.msra.mxu1 %v3454_v37 }
 0x5b7   :  { %1892 = vmatprep.subr.bf16.mxu0 %v3457_v7  ;;  %1933 = vmatprep.subr.bf16.mxu1 %v3460_v27 }
 0x5ba   :  { %1893 = vmatpush1.bf16.msra.mxu0 %v3463_v26  ;;  %1934 = vmatpush1.bf16.msra.mxu1 %v3466_v36 }
 0x5bb   :  { %1894 = vmatprep.subr.bf16.mxu0 %v3469_v15  ;;  %1935 = vmatprep.subr.bf16.mxu1 %v3472_v16 }
 0x5be   :  { %1895 = vmatpush1.bf16.msra.mxu0 %v3475_v17  ;;  %1936 = vmatpush1.bf16.msra.mxu1 %v3478_v18 }
 0x5bf   :  { %2010 = vmatprep.subr.bf16.mxu0 %v3370_v13  ;;  %2051 = vmatprep.subr.bf16.mxu1 %v3373_v14 }
 0x674   :  { %v1784_v20 = vpop.f32.mrb[52].mxu0  ;;  %v1825_v35 = vpop.f32.mrb[52].mxu1 }
 0x675   :  { %v1832_v3 = vadd.f32 %v1784_v20, %v3785_v5  ;;  %v1834_v2 = vadd.f32 %v1825_v35, %v3786_v50  ;;  %v1786_v49 = vpop.f32.mrb[53].mxu0  ;;  %v1827_v23 = vpop.f32.mrb[53].mxu1 }
 0x676   :  { %v1833_v1 = vadd.f32 %v1786_v49, %v3787_v4  ;;  %v1835_v46 = vadd.f32 %v1827_v23, %v3788_v12  ;;  %v1788_v13 = vpop.f32.mrb[54].mxu0  ;;  %v1829_v11 = vpop.f32.mrb[54].mxu1 }
 0x677   :  { %v2360_v14 = vmul.f32 -1.442695, %v1832_v3  ;;  %v1789_v45 = vpop.f32.mrb[55].mxu0  ;;  %v1830_v54 = vpop.f32.mrb[55].mxu1  ;;  %v2132_v13 = vld [vmem:[%s3650_s4 + $0x8] sm:$0xff] }
 0x678   :  { %v2361_v57 = vmul.f32 -1.442695, %v1833_v1  ;;  %v2362_v52 = vmul.f32 -1.442695, %v1835_v46  ;;  %v1864_v35 = vpop.permute.xlu1 %1863  ;;  %v2131_v46 = vld [vmem:[%s3650_s4] sm:$0xff]  ;;  %v2133_v45 = vld [vmem:[%s3650_s4 + $0x10] sm:$0xff] }
 0x679   :  { %2591 = vpow2.f32 %v2360_v14  ;;  %vm1865_vm12 = vcmp.eq.s32.totalorder %v1864_v35, 1  ;;  %v2424_v11 = vpack.c.bf16 %v2132_v13, %v2131_v46  ;;  %v2731_v14 = vmov 0.0|0.0   ;;  %v2134_v54 = vld [vmem:[%s3650_s4 + $0x18] sm:$0xff]  ;;  %v2144_v35 = vld [vmem:[%s3650_s4 + $0x68] sm:$0xff] }
 0x67a   :  { %2593 = vpow2.f32 %v2361_v57  ;;  %v2427_v57 = vpack.c.bf16 %v2134_v54, %v2133_v45 }
 0x67b   :  { %2595 = vpow2.f32 %v2362_v52  ;;  %v2135_v52 = vld [vmem:[%s3650_s4 + $0x20] sm:$0xff] }
 0x67c   :  { %2597 = vtanh.f32 %v1834_v2 }
 0x683   :  { %v2592_v55 = vpop.eup %2591 }
 0x684   :  { %v2594_v34 = vpop.eup %2593  ;;  %v1839_v39 = vadd.f32 1.0, %v2592_v55  ;;  %v2136_v55 = vld [vmem:[%s3650_s4 + $0x28] sm:$0xff] }
 0x685   :  { %v1845_v0 = vadd.f32 1.0, %v2594_v34  ;;  %v2596_v40 = vpop.eup %2595  ;;  %v2430_v34 = vpack.c.bf16 %v2136_v55, %v2135_v52 }
 0x686   :  { %2599 = vrcp.f32 %v1839_v39  ;;  %v2598_v63 = vpop.eup %2597  ;;  %v1852_v59 = vadd.f32 1.0, %v2596_v40  ;;  %v2137_v39 = vld [vmem:[%s3650_s4 + $0x30] sm:$0xff] }
 0x687   :  { %2601 = vrcp.f32 %v1845_v0  ;;  %v2138_v0 = vld [vmem:[%s3650_s4 + $0x38] sm:$0xff] }
 0x688   :  { %2603 = vrcp.f32 %v1852_v59  ;;  %v2433_v40 = vpack.c.bf16 %v2138_v0, %v2137_v39  ;;  %v2142_v59 = vld [vmem:[%s3650_s4 + $0x58] sm:$0xff] }
 0x690   :  { %v2600_v24 = vpop.eup %2599 }
 0x691   :  { %v2602_v48 = vpop.eup %2601  ;;  %v1856_v9 = vmul.f32 %v2600_v24, %v2598_v63  ;;  %v2139_v63 = vld [vmem:[%s3650_s4 + $0x40] sm:$0xff]  ;;  %v2140_v24 = vld [vmem:[%s3650_s4 + $0x48] sm:$0xff] }
 0x692   :  { %v1855_v53 = vmul.f32 %v2602_v48, %v3490_v42  ;;  %v2604_v5 = vpop.eup %2603  ;;  %v1994_v42 = vpop.permute.xlu0 %1993  ;;  %v2436_v48 = vpack.c.bf16 %v2140_v24, %v2139_v63 }
 0x693   :  { %vm1995_vm14 = vcmp.eq.s32.totalorder %v1994_v42, 1  ;;  %v3797_v42 = vlaneseq }
 0x694   :  { %v3537_v20 = vadd.f32 %v1856_v9, %v1855_v53  ;;  %v2141_v9 = vld [vmem:[%s3650_s4 + $0x50] sm:$0xff] }
 0x695   :  { %v2439_v53 = vpack.c.bf16 %v2142_v59, %v2141_v9 }
 0x696   :  { %2605 = vtanh.f32 %v3537_v20 }
 0x6a0   :  { %v2606_v3 = vpop.eup %2605 }
 0x6a1   :  { %v1859_v50 = vmul.f32 %v2606_v3, %v2604_v5  ;;  %v2145_v3 = vld [vmem:[%s3650_s4 + $0x70] sm:$0xff] }
 0x6a3   :  { %v3541_v2 = vsel %vm1865_vm12, %v1859_v50, %v3494_v56  ;;  %v1879_v49 = vpack.c.bf16 %v1859_v50, %v1859_v50  ;;  %v2146_v50 = vld [vmem:[%s3650_s4 + $0x78] sm:$0xff] }
 0x6a5   :  { %1913 = vmatmul.mubr.bf16.vlgmr.msra.gmra.mrb[56].mxu0 %v1879_v49  ;;  %1954 = vmatmul.mubr.bf16.vlgmr.msra.gmra.mrb[56].mxu1 %v1879_v49  ;;  %v2733_v49 = vmov 0.0  }
 0x6a6   :  { %2011 = vmatpush1.bf16.msra.mxu0 %v3389_v29  ;;  %2052 = vmatpush1.bf16.msra.mxu1 %v3392_v51  ;;  %v2121_v29 = vsel %vm2120_vm13, 1, %v3753_v61 }
 0x6a7   :  { %2012 = vmatprep.subr.bf16.mxu0 %v3395_v19  ;;  %2053 = vmatprep.subr.bf16.mxu1 %v3398_v43  ;;  %v3789_v43 = vld [vmem:[#allocation40_spill] sm:$0xff] }
 0x6a8   :  { %2042 = vmatprep.mubr.bf16.mxu0 %v3753_v61  ;;  %2083 = vmatprep.mubr.bf16.mxu1 %v3753_v61 }
 0x6a9   :  { %2123 = vperm.xlu1 %2458, %v2121_v29  }
 0x6aa   :  { %2013 = vmatpush1.bf16.msra.mxu0 %v3403_v44  ;;  %2054 = vmatpush1.bf16.msra.mxu1 %v3406_v21  ;;  %v3790_v21 = vld [vmem:[#allocation42_spill] sm:$0xff] }
 0x6ab   :  { %2014 = vmatprep.subr.bf16.mxu0 %v3409_v41  ;;  %2055 = vmatprep.subr.bf16.mxu1 %v3412_v32 }
 0x6ae   :  { %2015 = vmatpush1.bf16.msra.mxu0 %v3415_v25  ;;  %2056 = vmatpush1.bf16.msra.mxu1 %v3418_v58  ;;  %v3791_v58 = vld [vmem:[#allocation43_spill] sm:$0xff] }
 0x6af   :  { %2016 = vmatprep.subr.bf16.mxu0 %v3421_v30  ;;  %2057 = vmatprep.subr.bf16.mxu1 %v3424_v47  ;;  %v3792_v47 = vld [vmem:[#allocation44_spill] sm:$0xff] }
 0x6b2   :  { %2017 = vmatpush1.bf16.msra.mxu0 %v3427_v6  ;;  %2058 = vmatpush1.bf16.msra.mxu1 %v3430_v10 }
 0x6b3   :  { %2018 = vmatprep.subr.bf16.mxu0 %v3433_v62  ;;  %2059 = vmatprep.subr.bf16.mxu1 %v3436_v33 }
 0x6b6   :  { %2019 = vmatpush1.bf16.msra.mxu0 %v3439_v22  ;;  %2060 = vmatpush1.bf16.msra.mxu1 %v3442_v31 }
 0x6b7   :  { %2020 = vmatprep.subr.bf16.mxu0 %v3445_v38  ;;  %2061 = vmatprep.subr.bf16.mxu1 %v3448_v8 }
 0x6ba   :  { %2021 = vmatpush1.bf16.msra.mxu0 %v3451_v28  ;;  %2062 = vmatpush1.bf16.msra.mxu1 %v3454_v37 }
 0x6bb   :  { %2022 = vmatprep.subr.bf16.mxu0 %v3457_v7  ;;  %2063 = vmatprep.subr.bf16.mxu1 %v3460_v27 }
 0x6be   :  { %2023 = vmatpush1.bf16.msra.mxu0 %v3463_v26  ;;  %2064 = vmatpush1.bf16.msra.mxu1 %v3466_v36 }
 0x6bf   :  { %2024 = vmatprep.subr.bf16.mxu0 %v3469_v15  ;;  %2065 = vmatprep.subr.bf16.mxu1 %v3472_v16 }
 0x6c2   :  { %2025 = vmatpush1.bf16.msra.mxu0 %v3475_v17  ;;  %2066 = vmatpush1.bf16.msra.mxu1 %v3478_v18 }
 0x6c3   :  { %2423 = vmatprep.subr.bf16.mxu0 %v2731_v14 }
 0x778   :  { %v1914_v51 = vpop.f32.mrb[56].mxu0  ;;  %v1955_v19 = vpop.f32.mrb[56].mxu1 }
 0x779   :  { %v1962_v44 = vadd.f32 %v1914_v51, %v3789_v43  ;;  %v1964_v41 = vadd.f32 %v1955_v19, %v3790_v21  ;;  %v1916_v32 = vpop.f32.mrb[57].mxu0  ;;  %v1957_v25 = vpop.f32.mrb[57].mxu1  ;;  %v3793_v19 = vld [vmem:[#allocation37_spill] sm:$0xff] }
 0x77a   :  { %v1963_v30 = vadd.f32 %v1916_v32, %v3791_v58  ;;  %v1965_v6 = vadd.f32 %v1957_v25, %v3792_v47  ;;  %v1918_v10 = vpop.f32.mrb[58].mxu0  ;;  %v1959_v62 = vpop.f32.mrb[58].mxu1  ;;  %v3795_v25 = vld [vmem:[#allocation39_spill] sm:$0xff] }
 0x77b   :  { %v2363_v33 = vmul.f32 -1.442695, %v1962_v44  ;;  %v1919_v22 = vpop.f32.mrb[59].mxu0  ;;  %v1960_v60 = vpop.f32.mrb[59].mxu1  ;;  %v3794_v44 = vld [vmem:[#allocation38_spill] sm:$0xff] }
 0x77c   :  { %v2364_v31 = vmul.f32 -1.442695, %v1963_v30  ;;  %v2365_v61 = vmul.f32 -1.442695, %v1965_v6  ;;  %v3796_v30 = vld [vmem:[#allocation41_spill] sm:$0xff] }
 0x77d   :  { %2607 = vpow2.f32 %v2363_v33 }
 0x77e   :  { %2609 = vpow2.f32 %v2364_v31 }
 0x77f   :  { %2611 = vpow2.f32 %v2365_v61 }
 0x780   :  { %2613 = vtanh.f32 %v1964_v41 }
 0x787   :  { %v2608_v38 = vpop.eup %2607 }
 0x788   :  { %v2610_v8 = vpop.eup %2609  ;;  %v1969_v28 = vadd.f32 1.0, %v2608_v38 }
 0x789   :  { %v1975_v37 = vadd.f32 1.0, %v2610_v8  ;;  %v2612_v7 = vpop.eup %2611 }
 0x78a   :  { %2615 = vrcp.f32 %v1969_v28  ;;  %v2614_v27 = vpop.eup %2613  ;;  %v1982_v16 = vadd.f32 1.0, %v2612_v7 }
 0x78b   :  { %2617 = vrcp.f32 %v1975_v37 }
 0x78c   :  { %2619 = vrcp.f32 %v1982_v16 }
 0x794   :  { %v2616_v26 = vpop.eup %2615 }
 0x795   :  { %v2618_v36 = vpop.eup %2617  ;;  %v1986_v15 = vmul.f32 %v2616_v26, %v2614_v27 }
 0x796   :  { %v1985_v17 = vmul.f32 %v2618_v36, %v3537_v20  ;;  %v2620_v56 = vpop.eup %2619  ;;  %v2143_v20 = vld [vmem:[%s3650_s4 + $0x60] sm:$0xff] }
 0x797   :  { %v2442_v5 = vpack.c.bf16 %v2144_v35, %v2143_v20 }
 0x798   :  { %v3582_v18 = vadd.f32 %v1986_v15, %v1985_v17 }
 0x79a   :  { %2621 = vtanh.f32 %v3582_v18 }
 0x7a4   :  { %v2622_v23 = vpop.eup %2621 }
 0x7a5   :  { %v1989_v4 = vmul.f32 %v2622_v23, %v2620_v56  ;;  %v2128_v56 = vand.u32 127, %v3797_v42 }
 0x7a7   :  { %v3586_v1 = vsel %vm1995_vm14, %v1989_v4, %v3541_v2  ;;  %v2009_v12 = vpack.c.bf16 %v1989_v4, %v1989_v4  ;;  %v2445_v2 = vpack.c.bf16 %v2146_v50, %v2145_v3  ;;  %v2124_v4 = vpop.permute.xlu1 %2123  ;;  %vm2129_vm0 = vcmp.lt.s32.totalorder %v2128_v56, 32 }
 0x7a8   :  { %vm2125_vm1 = vcmp.eq.s32.totalorder %v2124_v4, 1 }
 0x7a9   :  { %2043 = vmatmul.mubr.bf16.vlgmr.msra.gmra.mrb[60].mxu0 %v2009_v12  ;;  %2084 = vmatmul.mubr.bf16.vlgmr.msra.gmra.mrb[60].mxu1 %v2009_v12 }
 0x7aa   :  { %2425 = vmatpush3.bf16.msra.mxu0 %v2424_v11  ;;  %2420 = vmatprep.mubr.msk.f32.mxu0 %vm2732_vm15, %v2733_v49 }
 0x7ab   :  { %2426 = vmatprep.subr.bf16.mxu0 %v2731_v14 }
 0x7ae   :  { %2428 = vmatpush3.bf16.msra.mxu0 %v2427_v57 }
 0x7af   :  { %2429 = vmatprep.subr.bf16.mxu0 %v2731_v14 }
 0x7b2   :  { %2431 = vmatpush3.bf16.msra.mxu0 %v2430_v34 }
 0x7b3   :  { %2432 = vmatprep.subr.bf16.mxu0 %v2731_v14 }
 0x7b6   :  { %2434 = vmatpush3.bf16.msra.mxu0 %v2433_v40 }
 0x7b7   :  { %2435 = vmatprep.subr.bf16.mxu0 %v2731_v14 }
 0x7ba   :  { %2437 = vmatpush3.bf16.msra.mxu0 %v2436_v48 }
 0x7bb   :  { %2438 = vmatprep.subr.bf16.mxu0 %v2731_v14 }
 0x7be   :  { %2440 = vmatpush3.bf16.msra.mxu0 %v2439_v53 }
 0x7bf   :  { %2441 = vmatprep.subr.bf16.mxu0 %v2731_v14 }
 0x7c2   :  { %2443 = vmatpush3.bf16.msra.mxu0 %v2442_v5 }
 0x7c3   :  { %2444 = vmatprep.subr.bf16.mxu0 %v2731_v14  ;;  %v2369_v14 = vld [vmem:[#allocation3] ss:$0 sm:$0xff] }
 0x7c6   :  { %2446 = vmatpush3.bf16.msra.mxu0 %v2445_v2 }
 0x87c   :  { %v2044_v29 = vpop.f32.mrb[60].mxu0  ;;  %v2085_v51 = vpop.f32.mrb[60].mxu1 }
 0x87d   :  { %v2092_v43 = vadd.f32 %v2044_v29, %v3793_v19  ;;  %v2094_v21 = vadd.f32 %v2085_v51, %v3794_v44  ;;  %v2046_v41 = vpop.f32.mrb[61].mxu0  ;;  %v2087_v32 = vpop.f32.mrb[61].mxu1 }
 0x87e   :  { %v2093_v58 = vadd.f32 %v2046_v41, %v3795_v25  ;;  %v2095_v47 = vadd.f32 %v2087_v32, %v3796_v30  ;;  %v2048_v6 = vpop.f32.mrb[62].mxu0  ;;  %v2089_v10 = vpop.f32.mrb[62].mxu1 }
 0x87f   :  { %v2366_v62 = vmul.f32 -1.442695, %v2092_v43  ;;  %v2049_v33 = vpop.f32.mrb[63].mxu0  ;;  %v2090_v22 = vpop.f32.mrb[63].mxu1 }
 0x880   :  { %v2367_v60 = vmul.f32 -1.442695, %v2093_v58  ;;  %v2368_v31 = vmul.f32 -1.442695, %v2095_v47 }
 0x881   :  { %2623 = vpow2.f32 %v2366_v62 }
 0x882   :  { %2625 = vpow2.f32 %v2367_v60 }
 0x883   :  { %2627 = vpow2.f32 %v2368_v31 }
 0x884   :  { %2629 = vtanh.f32 %v2094_v21 }
 0x88b   :  { %v2624_v61 = vpop.eup %2623 }
 0x88c   :  { %v2626_v38 = vpop.eup %2625  ;;  %v2099_v8 = vadd.f32 1.0, %v2624_v61 }
 0x88d   :  { %v2105_v28 = vadd.f32 1.0, %v2626_v38  ;;  %v2628_v37 = vpop.eup %2627 }
 0x88e   :  { %2631 = vrcp.f32 %v2099_v8  ;;  %v2630_v7 = vpop.eup %2629  ;;  %v2112_v15 = vadd.f32 1.0, %v2628_v37 }
 0x88f   :  { %2633 = vrcp.f32 %v2105_v28 }
 0x890   :  { %2635 = vrcp.f32 %v2112_v15 }
 0x898   :  { %v2632_v27 = vpop.eup %2631 }
 0x899   :  { %v2634_v26 = vpop.eup %2633  ;;  %v2116_v36 = vmul.f32 %v2632_v27, %v2630_v7 }
 0x89a   :  { %v2115_v16 = vmul.f32 %v2634_v26, %v3582_v18  ;;  %v2636_v23 = vpop.eup %2635 }
 0x89c   :  { %v2117_v17 = vadd.f32 %v2116_v36, %v2115_v16 }
 0x89e   :  { %2637 = vtanh.f32 %v2117_v17 }
 0x8a8   :  { %v2638_v12 = vpop.eup %2637 }
 0x8a9   :  { %v2119_v46 = vmul.f32 %v2638_v12, %v2636_v23 }
 0x8ab   :  { %v2126_v13 = vsel %vm2125_vm1, %v2119_v46, %v3586_v1 }
 0x8ac   :  { %v2130_v11 = vsel %vm2129_vm0, %v2126_v13, %v2119_v46 }
 0x8ad   :  { %2421 = vmatmul.mubr.f32.vlgmr.msra.gmra.mrb[64].mxu0 %v2130_v11 }
 0x980   :  { %v2220_v45 = vpop.f32.mrb[64].mxu0 }
 0x981   :  { %v2221_v54 = vadd.f32 %v2369_v14, %v2220_v45  ;;  %v2422_v57 = vpop.f32.mrb[65].mxu0 }
 0x983   :  { %v2370_v18 = vmul.f32 -1.442695, %v2221_v54 }
 0x985   :  { %2639 = vpow2.f32 %v2370_v18 }
 0x98f   :  { %v2640_v52 = vpop.eup %2639 }
 0x990   :  { %v2227_v55 = vadd.f32 1.0, %v2640_v52 }
 0x992   :  { %2641 = vrcp.f32 %v2227_v55 }
 0x99c   :  { %v2642_v34 = vpop.eup %2641 }
 0x99d   :  { %2231 = vst.msk [vmem:[%s3653_s7] sm:$0xff] %vm2230_vm2, %v2642_v34 }
 0x99e   :  { %2236 = vsyncpa [#allocation5], 1 }
 0x99f   :  { %2237 = vsyncpa [#allocation7], 1 }

</bundles_post_ra>
